<compile_context>
chip_gen: v7x
topology: tpu7x:2x2x1
jax: 0.10.0
libtpu: 0.0.40
codegen_flags: <defaults>
</compile_context>

<pallas_src>
import functools

import jax
import jax.numpy as jnp
from jax.experimental import pallas as pl
from jax.experimental.pallas import tpu as pltpu

IN_DIM = 768
HID_DIM = 512


def _round_up(x, m):
    return ((x + m - 1) // m) * m


def _choose_tile(b_pad, max_tb=1024):
    """Largest 128-multiple tile that divides b_pad, <= max_tb, and (when
    possible) yields >= 2 tiles so both v7x TensorCores get work."""
    n128 = b_pad // 128
    best = 128
    for d in range(1, n128 + 1):
        if n128 % d:
            continue
        tb = d * 128
        if tb > max_tb:
            break
        if n128 == 1 or (n128 // d) >= 2:
            best = tb
    return best


@functools.lru_cache(maxsize=1)
def _resident_spec_kwargs():
    """Probe once (tiny compile) whether pl.Buffered(1) single-buffering lowers.

    The constant index_map already prevents re-DMA of the weights per grid
    step, so Buffered(1) is purely a VMEM saving; falling back to default
    double buffering is always correct.
    """
    try:
        spec = pl.BlockSpec((8, 128), lambda i: (0, 0),
                            pipeline_mode=pl.Buffered(1))

        def _probe(a_ref, o_ref):
            o_ref[...] = a_ref[...]

        probe = pl.pallas_call(
            _probe,
            out_shape=jax.ShapeDtypeStruct((8, 128), jnp.float32),
            grid=(2,),
            in_specs=[spec],
            out_specs=pl.BlockSpec((8, 128), lambda i: (0, 0)),
        )
        jax.jit(probe).lower(jnp.zeros((8, 128), jnp.float32)).compile()
        return {"pipeline_mode": pl.Buffered(1)}
    except Exception:
        return {}


def critic_kernel(x_ref, w1_ref, b1_ref, w2_ref, b2_ref, o_ref):
    # x_ref:  (TB, 768)   batch tile (f32 or bf16)
    # w1_ref: (768, 512)  bf16, resident across the grid
    # b1_ref: (1, 512)    f32, resident
    # w2_ref: (512, 1)    f32, resident
    # b2_ref: (1,)        f32 scalar in SMEM
    # o_ref:  (TB, 1)
    x = x_ref[...].astype(jnp.bfloat16)  # VPU cast, hidden under the MXU

    # Linear(768 -> 512): bf16 operands, f32 accumulation; bias/ReLU in f32.
    h = jnp.dot(x, w1_ref[...], preferred_element_type=jnp.float32)
    h = jnp.maximum(h + b1_ref[...], 0.0)

    # Dropout: identity at inference (eval) time.

    # Linear(512 -> 1): plain h @ w2_col, no transpose of h needed.
    y = jnp.dot(h, w2_ref[...], preferred_element_type=jnp.float32) + b2_ref[0]
    o_ref[...] = y.astype(o_ref.dtype)


def critic_forward(state, w1, b1, w2, b2, *, max_tb=1024):
    """state: (B, 768) -> value: (B,) f32 (0-d for B == 1, like torch .squeeze())."""
    B, D = state.shape
    assert D == IN_DIM

    B_pad = _round_up(max(B, 1), 128)
    tb = _choose_tile(B_pad, max_tb)
    n_tiles = B_pad // tb

    # Keep the dominant activation stream in the caller's dtype (bf16 passes
    # straight through and halves HBM traffic); the kernel casts to bf16
    # right before the MXU either way.
    x = state
    if x.dtype not in (jnp.float32, jnp.bfloat16):
        x = x.astype(jnp.float32)
    if B_pad != B:
        x = jnp.pad(x, ((0, B_pad - B), (0, 0)))

    w1_bf = w1.astype(jnp.bfloat16)                       # bf16 operands, f32 acc
    b1_row = b1.reshape(1, HID_DIM).astype(jnp.float32)
    w2_col = w2.reshape(HID_DIM, 1).astype(jnp.float32)
    b2_s = b2.reshape(1).astype(jnp.float32)              # SMEM scalar

    cost = pl.CostEstimate(
        flops=2 * B_pad * IN_DIM * HID_DIM + 2 * B_pad * HID_DIM,
        transcendentals=0,
        bytes_accessed=int(x.dtype.itemsize * B_pad * IN_DIM
                           + 2 * IN_DIM * HID_DIM
                           + 4 * (2 * HID_DIM + 1 + B_pad)),
    )

    resident = _resident_spec_kwargs()

    call = pl.pallas_call(
        critic_kernel,
        out_shape=jax.ShapeDtypeStruct((B_pad, 1), jnp.float32),
        grid_spec=pltpu.PrefetchScalarGridSpec(
            num_scalar_prefetch=0,
            grid=(n_tiles,),
            in_specs=[
                pl.BlockSpec((tb, IN_DIM), lambda i: (i, 0)),                  # x tile
                pl.BlockSpec((IN_DIM, HID_DIM), lambda i: (0, 0), **resident),  # w1
                pl.BlockSpec((1, HID_DIM), lambda i: (0, 0), **resident),       # b1
                pl.BlockSpec((HID_DIM, 1), lambda i: (0, 0), **resident),       # w2
                pl.BlockSpec(memory_space=pltpu.MemorySpace.SMEM),              # b2
            ],
            out_specs=pl.BlockSpec((tb, 1), lambda i: (i, 0)),
        ),
        compiler_params=pltpu.CompilerParams(
            dimension_semantics=("parallel",),
            vmem_limit_bytes=32 * 1024 * 1024,
        ),
        cost_estimate=cost,
    )
    out = call(x, w1_bf, b1_row, w2_col, b2_s)

    value = out.reshape(B_pad)[:B]
    if B == 1:
        return value[0]  # torch .squeeze() on a (1, 1) result -> 0-d
    return value


def init_params(key):
    """Deterministic synthetic init (PyTorch-Linear-style uniform bounds)."""
    k1, k2, k3, k4 = jax.random.split(key, 4)
    bound1 = 1.0 / jnp.sqrt(IN_DIM)
    bound2 = 1.0 / jnp.sqrt(HID_DIM)
    w1 = jax.random.uniform(k1, (IN_DIM, HID_DIM), jnp.float32, -bound1, bound1)
    b1 = jax.random.uniform(k2, (HID_DIM,), jnp.float32, -bound1, bound1)
    w2 = jax.random.uniform(k3, (HID_DIM, 1), jnp.float32, -bound2, bound2)
    b2 = jax.random.uniform(k4, (1,), jnp.float32, -bound2, bound2)
    return w1, b1, w2, b2


def _reference(state, w1, b1, w2, b2):
    return (jnp.maximum(state @ w1 + b1, 0.0) @ w2 + b2).reshape(state.shape[0])


if __name__ == "__main__":
    key = jax.random.PRNGKey(0)
    k_params, k_state_small, k_state_big = jax.random.split(key, 3)
    w1, b1, w2, b2 = init_params(k_params)

    # Small batch (pads to a single 128-row tile).
    B = 8
    state = jax.random.normal(k_state_small, (B, IN_DIM), jnp.float32)
    value = critic_forward(state, w1, b1, w2, b2)
    jax.block_until_ready(value)
    ref = _reference(state, w1, b1, w2, b2)
    assert value.shape == (B,)
    # bf16 MXU operands with f32 accumulation -> loosened tolerance vs f32 ref.
    assert jnp.allclose(value, ref, atol=2e-2, rtol=2e-2)

    # Ragged larger batch (pads 600 -> 640, five 128-row tiles, multi-tile grid).
    B2 = 600
    state2 = jax.random.normal(k_state_big, (B2, IN_DIM), jnp.float32)
    value2 = critic_forward(state2, w1, b1, w2, b2)
    jax.block_until_ready(value2)
    ref2 = _reference(state2, w1, b1, w2, b2)
    assert value2.shape == (B2,)
    assert jnp.allclose(value2, ref2, atol=2e-2, rtol=2e-2)

    print("KERNEL_OK")
</pallas_src>

<mosaic_0001>
module attributes {stable_mosaic.version = 11 : i64} {
  func.func @critic_kernel(%arg0: i32, %arg1: memref<128x768xf32, #tpu.memory_space<vmem>>, %arg2: memref<768x512xbf16, #tpu.memory_space<vmem>>, %arg3: memref<1x512xf32, #tpu.memory_space<vmem>>, %arg4: memref<512x1xf32, #tpu.memory_space<vmem>>, %arg5: memref<1xf32, #tpu.memory_space<smem>>, %arg6: memref<128x1xf32, #tpu.memory_space<vmem>>) attributes {dimension_semantics = [#tpu.dimension_semantics<parallel>], iteration_bounds = array<i64: 1>, scalar_prefetch = 0 : i64, scratch_operands = 0 : i64, tpu.core_type = #tpu.core_type<tc>, window_params = [{transform_indices = @transform_0, window_bounds = array<i64: 128, 768>}, {pipeline_mode = #tpu.pipeline_mode<synchronous>, transform_indices = @transform_1, window_bounds = array<i64: 768, 512>}, {pipeline_mode = #tpu.pipeline_mode<synchronous>, transform_indices = @transform_2, window_bounds = array<i64: 1, 512>}, {pipeline_mode = #tpu.pipeline_mode<synchronous>, transform_indices = @transform_3, window_bounds = array<i64: 512, 1>}, {transform_indices = @transform_4, window_bounds = array<i64: 1>}, {transform_indices = @transform_5, window_bounds = array<i64: 128, 1>}]} {
    %c0 = arith.constant 0 : index
    %c0_0 = arith.constant 0 : index
    %0 = vector.load %arg1[%c0, %c0_0] : memref<128x768xf32, #tpu.memory_space<vmem>>, vector<128x768xf32>
    %1 = arith.truncf %0 : vector<128x768xf32> to vector<128x768xbf16>
    %c0_1 = arith.constant 0 : index
    %c0_2 = arith.constant 0 : index
    %2 = vector.load %arg2[%c0_1, %c0_2] : memref<768x512xbf16, #tpu.memory_space<vmem>>, vector<768x512xbf16>
    %cst = arith.constant dense<0.000000e+00> : vector<128x512xf32>
    %3 = tpu.matmul %1, %2, %cst {dimension_numbers = #tpu.dot_dimension_numbers<[1], [0], [0], [1], [0, 0, 1, 1], [], []>} : vector<128x768xbf16>, vector<768x512xbf16>, vector<128x512xf32> -> vector<128x512xf32>
    %c0_3 = arith.constant 0 : index
    %c0_4 = arith.constant 0 : index
    %4 = vector.load %arg3[%c0_3, %c0_4] : memref<1x512xf32, #tpu.memory_space<vmem>>, vector<1x512xf32>
    %5 = vector.broadcast %4 : vector<1x512xf32> to vector<128x512xf32>
    %6 = arith.addf %3, %5 : vector<128x512xf32>
    %cst_5 = arith.constant 0.000000e+00 : f32
    %7 = vector.broadcast %cst_5 : f32 to vector<128x512xf32>
    %8 = arith.maximumf %6, %7 : vector<128x512xf32>
    %c0_6 = arith.constant 0 : index
    %c0_7 = arith.constant 0 : index
    %9 = vector.load %arg4[%c0_6, %c0_7] : memref<512x1xf32, #tpu.memory_space<vmem>>, vector<512x1xf32>
    %cst_8 = arith.constant dense<0.000000e+00> : vector<128x1xf32>
    %10 = tpu.matmul %8, %9, %cst_8 {dimension_numbers = #tpu.dot_dimension_numbers<[1], [0], [0], [1], [0, 0, 1, 1], [], []>} : vector<128x512xf32>, vector<512x1xf32>, vector<128x1xf32> -> vector<128x1xf32>
    %c0_9 = arith.constant 0 : index
    %11 = memref.load %arg5[%c0_9] : memref<1xf32, #tpu.memory_space<smem>>
    %12 = vector.broadcast %11 : f32 to vector<128x1xf32>
    %13 = arith.addf %10, %12 : vector<128x1xf32>
    %c0_10 = arith.constant 0 : index
    %c0_11 = arith.constant 0 : index
    %14 = vector.load %arg6[%c0_10, %c0_11] : memref<128x1xf32, #tpu.memory_space<vmem>>, vector<128x1xf32>
    tpu.vector_store %arg6[%c0_10, %c0_11], %13 {strides = array<i32>} : memref<128x1xf32, #tpu.memory_space<vmem>>, vector<128x1xf32>,
    return
  }
  func.func @transform_0(%arg0: i32) -> (i32, i32) {
    %c0_i32 = arith.constant 0 : i32
    %c0_i32_0 = arith.constant 0 : i32
    return %arg0, %c0_i32 : i32, i32
  }
  func.func @transform_1(%arg0: i32) -> (i32, i32) {
    %c0_i32 = arith.constant 0 : i32
    %c0_i32_0 = arith.constant 0 : i32
    %c0_i32_1 = arith.constant 0 : i32
    return %c0_i32, %c0_i32_0 : i32, i32
  }
  func.func @transform_2(%arg0: i32) -> (i32, i32) {
    %c0_i32 = arith.constant 0 : i32
    %c0_i32_0 = arith.constant 0 : i32
    %c0_i32_1 = arith.constant 0 : i32
    return %c0_i32, %c0_i32_0 : i32, i32
  }
  func.func @transform_3(%arg0: i32) -> (i32, i32) {
    %c0_i32 = arith.constant 0 : i32
    %c0_i32_0 = arith.constant 0 : i32
    %c0_i32_1 = arith.constant 0 : i32
    return %c0_i32, %c0_i32_0 : i32, i32
  }
  func.func @transform_4(%arg0: i32) -> i32 {
    %c0_i32 = arith.constant 0 : i32
    %c0_i32_0 = arith.constant 0 : i32
    return %c0_i32 : i32
  }
  func.func @transform_5(%arg0: i32) -> (i32, i32) {
    %c0_i32 = arith.constant 0 : i32
    %c0_i32_0 = arith.constant 0 : i32
    return %arg0, %c0_i32 : i32, i32
  }
}

</mosaic_0001>

<bundles_post_ra>
// kernel: tpu_custom_call.1
= control target key start
LH: loop header
LB: loop body
LE: loop exit
PB: predicated region body
PF: predicated region fallthrough
CT: control target
= control target key end

     0   :  { %11 = vsyncpa [#allocation4], 0  ;;  %s3850_s0 = inlined_call_operand.hbm [shape: f32[128,768], index: 0, kind: input, shape index: {}]   ;;  %s3851_s1 = inlined_call_operand.hbm [shape: bf16[768,512], index: 1, kind: input, shape index: {}]   ;;  %s3852_s2 = inlined_call_operand.vmem [shape: f32[1,512], index: 2, kind: input, shape index: {}]   ;;  %s3853_s3 = inlined_call_operand.vmem [shape: f32[512,1], index: 3, kind: input, shape index: {}]   ;;  %s3854_s4 = inlined_call_operand.<no memory space> [shape: f32[1], index: 4, kind: input, shape index: {}]   ;;  %s3855_s5 = inlined_call_operand.vmem [shape: f32[128,1], index: 5, kind: output, shape index: {}]  }
   0x1   :  { %12 = vsyncpa [#allocation6], 0  ;;  %s3438_s18 = smov [#allocation3]   ;;  %s3390_s22 = scalar_lea.hbm %s3850_s0, 12288 }
   0x2   :  { %s18_s19 = sshll.u32 %s3438_s18, 4  ;;  %p3391_p0 = scmp.ne.s32.totalorder %s3850_s0, %s3390_s22  ;;  %s19_s19 = int_to_ptr.vmem [resolvable:$true] %s18_s19 }
   0x3   :  { %p3394_p1 = scmp.lt.u32.totalorder %s3390_s22, %s3850_s0 }
   0x5   :  { %p3396_p2 = pnand %p3394_p1, %p3391_p0 }
   0x7   :  { %3399 = shalt.err (!%p3396_p2)
}
   0x8   :  { %s3400_s27 = scalar_lea.vmem %s19_s19, 12288  ;;  %p3405_p4 = scmp.lt.s32.totalorder %s19_s19, %s19_s19 }
   0x9   :  { %p3401_p3 = scmp.ne.s32.totalorder %s19_s19, %s3400_s27  ;;  %p3406_p5 = scmp.lt.s32.totalorder %s3400_s27, %s3400_s27 }
   0xb   :  { %p3407_p6 = por %p3406_p5, %p3405_p4 }
   0xd   :  { %p3408_p7 = pnand %p3407_p6, %p3401_p3 }
   0xf   :  { %3411 = shalt.err (!%p3408_p7)
}
  0x10   :  { %s3439_s28 = smov 768   ;;  %s3440_s29 = smov 48  }
  0x11   :  { %24 = dma.hbm_to_vmem [thread:$0]  %s3850_s0, 12288, %s19_s19, [#allocation4], %s3439_s28, %s3439_s28, %s3440_s29  }
  0x12   :  { %s3441_s7 = smov [#allocation5]   ;;  %s3412_s11 = scalar_lea.hbm %s3851_s1, 24576 }
  0x13   :  { %s30_s8 = sshll.u32 %s3441_s7, 4  ;;  %p3413_p8 = scmp.ne.s32.totalorder %s3851_s1, %s3412_s11  ;;  %s31_s8 = int_to_ptr.vmem [resolvable:$true] %s30_s8 }
  0x14   :  { %p3416_p9 = scmp.lt.u32.totalorder %s3412_s11, %s3851_s1 }
  0x16   :  { %p3418_p10 = pnand %p3416_p9, %p3413_p8 }
  0x18   :  { %3421 = shalt.err (!%p3418_p10)
}
  0x19   :  { %s3422_s16 = scalar_lea.vmem %s31_s8, 24576  ;;  %p3427_p12 = scmp.lt.s32.totalorder %s31_s8, %s31_s8 }
  0x1a   :  { %p3423_p11 = scmp.ne.s32.totalorder %s31_s8, %s3422_s16  ;;  %p3428_p13 = scmp.lt.s32.totalorder %s3422_s16, %s3422_s16 }
  0x1c   :  { %p3429_p0 = por %p3428_p13, %p3427_p12 }
  0x1e   :  { %p3430_p1 = pnand %p3429_p0, %p3423_p11 }
  0x20   :  { %3433 = shalt.err (!%p3430_p1)
}
  0x21   :  { %s3442_s0 = smov 256   ;;  %s3443_s17 = smov 16  }
  0x22   :  { %36 = dma.hbm_to_vmem [thread:$0]  %s3851_s1, 24576, %s31_s8, [#allocation6], %s3442_s0, %s3442_s0, %s3443_s17  }
  0x23   :  { %3434 = dma.done.wait [#allocation4], 12288  }
  0x24   :  { %3435 = vsyncadd [#allocation4], 4294955008 }
  0x25   :  { %3436 = dma.done.wait [#allocation6], 24576  }
  0x26   :  { %3437 = vsyncadd [#allocation6], 4294942720  ;;  %v3102_v0 = vld [vmem:[#allocation5 + $0x4] ss:$16 sps:$4 sm:$0xff]   ;;  %v3104_v1 = vld [vmem:[#allocation5 + $0xc] ss:$16 sps:$4 sm:$0xff]  }
  0x27   :  { %1367 = vmatprep.subr.bf16.mxu0 %v3102_v0  ;;  %v3106_v2 = vld [vmem:[#allocation5] ss:$16 sps:$4 sm:$0xff]   ;;  %v3107_v3 = vld [vmem:[#allocation5 + $0x8] ss:$16 sps:$4 sm:$0xff]   ;;  %1706 = vmatprep.subr.bf16.mxu1 %v3104_v1  ;;  %v3108_v4 = vld [vmem:[#allocation5 + $0x24] ss:$16 sps:$4 sm:$0xff]  }
  0x28   :  { %1368 = vmatpush1.bf16.msra.mxu0 %v3106_v2  ;;  %1707 = vmatpush1.bf16.msra.mxu1 %v3107_v3  ;;  %v3110_v5 = vld [vmem:[#allocation5 + $0x2c] ss:$16 sps:$4 sm:$0xff]   ;;  %v3112_v6 = vld [vmem:[#allocation5 + $0x20] ss:$16 sps:$4 sm:$0xff]   ;;  %v3113_v7 = vld [vmem:[#allocation5 + $0x28] ss:$16 sps:$4 sm:$0xff]  }
  0x29   :  { %1369 = vmatprep.subr.bf16.mxu0 %v3108_v4  ;;  %1708 = vmatprep.subr.bf16.mxu1 %v3110_v5  ;;  %v3114_v8 = vld [vmem:[#allocation5 + $0x44] ss:$16 sps:$4 sm:$0xff]   ;;  %v3116_v9 = vld [vmem:[#allocation5 + $0x4c] ss:$16 sps:$4 sm:$0xff]   ;;  %v3118_v10 = vld [vmem:[#allocation5 + $0x40] ss:$16 sps:$4 sm:$0xff]  }
  0x2a   :  { %v3119_v11 = vld [vmem:[#allocation5 + $0x48] ss:$16 sps:$4 sm:$0xff]   ;;  %v3120_v12 = vld [vmem:[#allocation5 + $0x64] ss:$16 sps:$4 sm:$0xff]   ;;  %v3122_v13 = vld [vmem:[#allocation5 + $0x6c] ss:$16 sps:$4 sm:$0xff]  }
  0x2b   :  { %v3124_v14 = vld [vmem:[#allocation5 + $0x60] ss:$16 sps:$4 sm:$0xff]   ;;  %v3125_v15 = vld [vmem:[#allocation5 + $0x68] ss:$16 sps:$4 sm:$0xff]   ;;  %v3126_v16 = vld [vmem:[#allocation5 + $0x84] ss:$16 sps:$4 sm:$0xff]  }
  0x2c   :  { %1370 = vmatpush1.bf16.msra.mxu0 %v3112_v6  ;;  %1709 = vmatpush1.bf16.msra.mxu1 %v3113_v7  ;;  %v3128_v17 = vld [vmem:[#allocation5 + $0x8c] ss:$16 sps:$4 sm:$0xff]   ;;  %v3130_v18 = vld [vmem:[#allocation5 + $0x80] ss:$16 sps:$4 sm:$0xff]   ;;  %v3131_v19 = vld [vmem:[#allocation5 + $0x88] ss:$16 sps:$4 sm:$0xff]  }
  0x2d   :  { %1371 = vmatprep.subr.bf16.mxu0 %v3114_v8  ;;  %1710 = vmatprep.subr.bf16.mxu1 %v3116_v9  ;;  %v3132_v20 = vld [vmem:[#allocation5 + $0xa4] ss:$16 sps:$4 sm:$0xff]   ;;  %v3134_v21 = vld [vmem:[#allocation5 + $0xac] ss:$16 sps:$4 sm:$0xff]   ;;  %v3136_v22 = vld [vmem:[#allocation5 + $0xa0] ss:$16 sps:$4 sm:$0xff]  }
  0x2e   :  { %v3137_v23 = vld [vmem:[#allocation5 + $0xa8] ss:$16 sps:$4 sm:$0xff]   ;;  %v3138_v24 = vld [vmem:[#allocation5 + $0xc4] ss:$16 sps:$4 sm:$0xff]   ;;  %v3140_v25 = vld [vmem:[#allocation5 + $0xcc] ss:$16 sps:$4 sm:$0xff]  }
  0x2f   :  { %v3142_v26 = vld [vmem:[#allocation5 + $0xc0] ss:$16 sps:$4 sm:$0xff]   ;;  %v3143_v27 = vld [vmem:[#allocation5 + $0xc8] ss:$16 sps:$4 sm:$0xff]   ;;  %v3144_v28 = vld [vmem:[#allocation5 + $0xe4] ss:$16 sps:$4 sm:$0xff]  }
  0x30   :  { %1372 = vmatpush1.bf16.msra.mxu0 %v3118_v10  ;;  %1711 = vmatpush1.bf16.msra.mxu1 %v3119_v11  ;;  %v3146_v29 = vld [vmem:[#allocation5 + $0xec] ss:$16 sps:$4 sm:$0xff]   ;;  %v3148_v30 = vld [vmem:[#allocation5 + $0xe0] ss:$16 sps:$4 sm:$0xff]   ;;  %v3149_v31 = vld [vmem:[#allocation5 + $0xe8] ss:$16 sps:$4 sm:$0xff]  }
  0x31   :  { %1373 = vmatprep.subr.bf16.mxu0 %v3120_v12  ;;  %1712 = vmatprep.subr.bf16.mxu1 %v3122_v13  ;;  %v3150_v32 = vld [vmem:[#allocation5 + $0x104] ss:$16 sps:$4 sm:$0xff]   ;;  %v3152_v33 = vld [vmem:[#allocation5 + $0x10c] ss:$16 sps:$4 sm:$0xff]   ;;  %v3154_v34 = vld [vmem:[#allocation5 + $0x100] ss:$16 sps:$4 sm:$0xff]  }
  0x32   :  { %v3155_v35 = vld [vmem:[#allocation5 + $0x108] ss:$16 sps:$4 sm:$0xff]   ;;  %v3156_v36 = vld [vmem:[#allocation5 + $0x124] ss:$16 sps:$4 sm:$0xff]   ;;  %v3158_v37 = vld [vmem:[#allocation5 + $0x12c] ss:$16 sps:$4 sm:$0xff]  }
  0x33   :  { %v3160_v38 = vld [vmem:[#allocation5 + $0x120] ss:$16 sps:$4 sm:$0xff]   ;;  %v3161_v39 = vld [vmem:[#allocation5 + $0x128] ss:$16 sps:$4 sm:$0xff]   ;;  %v3162_v40 = vld [vmem:[#allocation5 + $0x144] ss:$16 sps:$4 sm:$0xff]  }
  0x34   :  { %1374 = vmatpush1.bf16.msra.mxu0 %v3124_v14  ;;  %1713 = vmatpush1.bf16.msra.mxu1 %v3125_v15  ;;  %v3164_v41 = vld [vmem:[#allocation5 + $0x14c] ss:$16 sps:$4 sm:$0xff]   ;;  %v3166_v42 = vld [vmem:[#allocation5 + $0x140] ss:$16 sps:$4 sm:$0xff]   ;;  %v3167_v43 = vld [vmem:[#allocation5 + $0x148] ss:$16 sps:$4 sm:$0xff]  }
  0x35   :  { %1375 = vmatprep.subr.bf16.mxu0 %v3126_v16  ;;  %1714 = vmatprep.subr.bf16.mxu1 %v3128_v17  ;;  %v3168_v44 = vld [vmem:[#allocation5 + $0x164] ss:$16 sps:$4 sm:$0xff]   ;;  %v3170_v45 = vld [vmem:[#allocation5 + $0x16c] ss:$16 sps:$4 sm:$0xff]   ;;  %v3172_v47 = vld [vmem:[#allocation5 + $0x160] ss:$16 sps:$4 sm:$0xff]  }
  0x36   :  { %v50_v46 = vld [vmem:[#allocation3 + $0x8] sm:$0xff]  ;;  %v56_v49 = vld [vmem:[#allocation3 + $0x38] sm:$0xff]  ;;  %v3174_v50 = vld [vmem:[#allocation5 + $0x184] ss:$16 sps:$4 sm:$0xff]   ;;  %vm2465_vm0 = vcmask 7168  }
  0x37   :  { %v3173_v48 = vld [vmem:[#allocation5 + $0x168] ss:$16 sps:$4 sm:$0xff]   ;;  %v146_v51 = vpack.c.bf16 %v56_v49, %v50_v46  ;;  %v3176_v52 = vld [vmem:[#allocation5 + $0x18c] ss:$16 sps:$4 sm:$0xff]   ;;  %v3178_v53 = vld [vmem:[#allocation5 + $0x180] ss:$16 sps:$4 sm:$0xff]  }
  0x38   :  { %1376 = vmatpush1.bf16.msra.mxu0 %v3130_v18  ;;  %1715 = vmatpush1.bf16.msra.mxu1 %v3131_v19  ;;  %v3179_v54 = vld [vmem:[#allocation5 + $0x188] ss:$16 sps:$4 sm:$0xff]   ;;  %v3180_v55 = vld [vmem:[#allocation5 + $0x1a4] ss:$16 sps:$4 sm:$0xff]   ;;  %v3182_v56 = vld [vmem:[#allocation5 + $0x1ac] ss:$16 sps:$4 sm:$0xff]  }
  0x39   :  { %1377 = vmatprep.subr.bf16.mxu0 %v3132_v20  ;;  %1716 = vmatprep.subr.bf16.mxu1 %v3134_v21  ;;  %v3184_v57 = vld [vmem:[#allocation5 + $0x1a0] ss:$16 sps:$4 sm:$0xff]   ;;  %v3185_v58 = vld [vmem:[#allocation5 + $0x1a8] ss:$16 sps:$4 sm:$0xff]   ;;  %v3186_v59 = vld [vmem:[#allocation5 + $0x1c4] ss:$16 sps:$4 sm:$0xff]  }
  0x3a   :  { %1399 = vmatprep.mubr.bf16.mxu0 %v146_v51  ;;  %1738 = vmatprep.mubr.bf16.mxu1 %v146_v51  ;;  %v3188_v60 = vld [vmem:[#allocation5 + $0x1cc] ss:$16 sps:$4 sm:$0xff]   ;;  %v3190_v61 = vld [vmem:[#allocation5 + $0x1c0] ss:$16 sps:$4 sm:$0xff]   ;;  %v3191_v62 = vld [vmem:[#allocation5 + $0x1c8] ss:$16 sps:$4 sm:$0xff]  }
  0x3b   :  { %v3192_v63 = vld [vmem:[#allocation5 + $0x1e4] ss:$16 sps:$4 sm:$0xff]   ;;  %v3194_v0 = vld [vmem:[#allocation5 + $0x1ec] ss:$16 sps:$4 sm:$0xff]   ;;  %v3196_v1 = vld [vmem:[#allocation5 + $0x1e0] ss:$16 sps:$4 sm:$0xff]  }
  0x3c   :  { %1378 = vmatpush1.bf16.msra.mxu0 %v3136_v22  ;;  %1717 = vmatpush1.bf16.msra.mxu1 %v3137_v23  ;;  %v3197_v2 = vld [vmem:[#allocation5 + $0x1e8] ss:$16 sps:$4 sm:$0xff]   ;;  %v49_v3 = vld [vmem:[#allocation3] sm:$0xff]  ;;  %v55_v4 = vld [vmem:[#allocation3 + $0x30] sm:$0xff] }
  0x3d   :  { %1379 = vmatprep.subr.bf16.mxu0 %v3138_v24  ;;  %1718 = vmatprep.subr.bf16.mxu1 %v3140_v25  ;;  %v3200_v5 = vld [vmem:[#allocation5 + $0x204] ss:$16 sps:$4 sm:$0xff]   ;;  %v3203_v6 = vld [vmem:[#allocation5 + $0x20c] ss:$16 sps:$4 sm:$0xff]   ;;  %v3198_v7 = vld [vmem:[#allocation5 + $0x200] ss:$16 sps:$4 sm:$0xff]   ;;  %v145_v8 = vpack.c.bf16 %v55_v4, %v49_v3 }
  0x3e   :  { %v3201_v9 = vld [vmem:[#allocation5 + $0x208] ss:$16 sps:$4 sm:$0xff]   ;;  %v3206_v12 = vld [vmem:[#allocation5 + $0x224] ss:$16 sps:$4 sm:$0xff]   ;;  %v3209_v13 = vld [vmem:[#allocation5 + $0x22c] ss:$16 sps:$4 sm:$0xff]  }
  0x3f   :  { %v62_v10 = vld [vmem:[#allocation3 + $0x68] sm:$0xff]  ;;  %v68_v11 = vld [vmem:[#allocation3 + $0x98] sm:$0xff]  ;;  %v3204_v14 = vld [vmem:[#allocation5 + $0x220] ss:$16 sps:$4 sm:$0xff]  }
  0x40   :  { %1380 = vmatpush1.bf16.msra.mxu0 %v3142_v26  ;;  %1719 = vmatpush1.bf16.msra.mxu1 %v3143_v27  ;;  %v152_v15 = vpack.c.bf16 %v68_v11, %v62_v10  ;;  %v3207_v16 = vld [vmem:[#allocation5 + $0x228] ss:$16 sps:$4 sm:$0xff]   ;;  %v61_v17 = vld [vmem:[#allocation3 + $0x60] sm:$0xff]  ;;  %v67_v18 = vld [vmem:[#allocation3 + $0x90] sm:$0xff] }
  0x41   :  { %1381 = vmatprep.subr.bf16.mxu0 %v3144_v28  ;;  %1720 = vmatprep.subr.bf16.mxu1 %v3146_v29  ;;  %v3212_v19 = vld [vmem:[#allocation5 + $0x244] ss:$16 sps:$4 sm:$0xff]   ;;  %v3215_v20 = vld [vmem:[#allocation5 + $0x24c] ss:$16 sps:$4 sm:$0xff]   ;;  %v3210_v21 = vld [vmem:[#allocation5 + $0x240] ss:$16 sps:$4 sm:$0xff]   ;;  %v151_v23 = vpack.c.bf16 %v67_v18, %v61_v17 }
  0x42   :  { %v3213_v22 = vld [vmem:[#allocation5 + $0x248] ss:$16 sps:$4 sm:$0xff]   ;;  %v3218_v26 = vld [vmem:[#allocation5 + $0x264] ss:$16 sps:$4 sm:$0xff]   ;;  %v3221_v27 = vld [vmem:[#allocation5 + $0x26c] ss:$16 sps:$4 sm:$0xff]  }
  0x43   :  { %v74_v24 = vld [vmem:[#allocation3 + $0xc8] sm:$0xff]  ;;  %v80_v25 = vld [vmem:[#allocation3 + $0xf8] sm:$0xff]  ;;  %v3216_v29 = vld [vmem:[#allocation5 + $0x260] ss:$16 sps:$4 sm:$0xff]  }
  0x44   :  { %1382 = vmatpush1.bf16.msra.mxu0 %v3148_v30  ;;  %1721 = vmatpush1.bf16.msra.mxu1 %v3149_v31  ;;  %v158_v28 = vpack.c.bf16 %v80_v25, %v74_v24  ;;  %v3219_v30 = vld [vmem:[#allocation5 + $0x268] ss:$16 sps:$4 sm:$0xff]   ;;  %v73_v31 = vld [vmem:[#allocation3 + $0xc0] sm:$0xff]  ;;  %v91_v46 = vld [vmem:[#allocation3 + $0x150] sm:$0xff] }
  0x45   :  { %1383 = vmatprep.subr.bf16.mxu0 %v3150_v32  ;;  %1722 = vmatprep.subr.bf16.mxu1 %v3152_v33  ;;  %v79_v32 = vld [vmem:[#allocation3 + $0xf0] sm:$0xff]  ;;  %v98_v51 = vld [vmem:[#allocation3 + $0x188] sm:$0xff]  ;;  %v128_v17 = vld [vmem:[#allocation3 + $0x278] sm:$0xff] }
  0x46   :  { %v3224_v33 = vld [vmem:[#allocation5 + $0x284] ss:$16 sps:$4 sm:$0xff]   ;;  %v3234_v49 = vld [vmem:[#allocation5 + $0x2c0] ss:$16 sps:$4 sm:$0xff]   ;;  %v3249_v3 = vld [vmem:[#allocation5 + $0x308] ss:$16 sps:$4 sm:$0xff]  }
  0x47   :  { %v3254_v4 = vld [vmem:[#allocation5 + $0x324] ss:$16 sps:$4 sm:$0xff]  }
  0x48   :  { %1384 = vmatpush1.bf16.msra.mxu0 %v3154_v34  ;;  %1723 = vmatpush1.bf16.msra.mxu1 %v3155_v35  ;;  %v3227_v34 = vld [vmem:[#allocation5 + $0x28c] ss:$16 sps:$4 sm:$0xff]   ;;  %v3222_v35 = vld [vmem:[#allocation5 + $0x280] ss:$16 sps:$4 sm:$0xff]   ;;  %v3260_v11 = vld [vmem:[#allocation5 + $0x344] ss:$16 sps:$4 sm:$0xff]  }
  0x49   :  { %1385 = vmatprep.subr.bf16.mxu0 %v3156_v36  ;;  %1724 = vmatprep.subr.bf16.mxu1 %v3158_v37  ;;  %v3225_v36 = vld [vmem:[#allocation5 + $0x288] ss:$16 sps:$4 sm:$0xff]   ;;  %v157_v37 = vpack.c.bf16 %v79_v32, %v73_v31  ;;  %v115_v10 = vld [vmem:[#allocation3 + $0x210] sm:$0xff] }
  0x4a   :  { %v3266_v18 = vld [vmem:[#allocation5 + $0x364] ss:$16 sps:$4 sm:$0xff]   ;;  %v140_v31 = vld [vmem:[#allocation3 + $0x2d8] sm:$0xff] }
  0x4b   :  { %v127_v24 = vld [vmem:[#allocation3 + $0x270] sm:$0xff] }
  0x4c   :  { %1386 = vmatpush1.bf16.msra.mxu0 %v3160_v38  ;;  %1725 = vmatpush1.bf16.msra.mxu1 %v3161_v39  ;;  %v86_v38 = vld [vmem:[#allocation3 + $0x128] sm:$0xff]  ;;  %v92_v39 = vld [vmem:[#allocation3 + $0x158] sm:$0xff]  ;;  %v3272_v25 = vld [vmem:[#allocation5 + $0x384] ss:$16 sps:$4 sm:$0xff]  }
  0x4d   :  { %1387 = vmatprep.subr.bf16.mxu0 %v3162_v40  ;;  %1726 = vmatprep.subr.bf16.mxu1 %v3164_v41  ;;  %v3230_v40 = vld [vmem:[#allocation5 + $0x2a4] ss:$16 sps:$4 sm:$0xff]   ;;  %v3233_v41 = vld [vmem:[#allocation5 + $0x2ac] ss:$16 sps:$4 sm:$0xff]  }
  0x4e   :  { %v3278_v32 = vld [vmem:[#allocation5 + $0x3a4] ss:$16 sps:$4 sm:$0xff]  }
  0x50   :  { %1388 = vmatpush1.bf16.msra.mxu0 %v3166_v42  ;;  %1727 = vmatpush1.bf16.msra.mxu1 %v3167_v43  ;;  %v3228_v42 = vld [vmem:[#allocation5 + $0x2a0] ss:$16 sps:$4 sm:$0xff]   ;;  %v164_v43 = vpack.c.bf16 %v92_v39, %v86_v38  ;;  %v3284_v39 = vld [vmem:[#allocation5 + $0x3c4] ss:$16 sps:$4 sm:$0xff]  }
  0x51   :  { %1389 = vmatprep.subr.bf16.mxu0 %v3168_v44  ;;  %1728 = vmatprep.subr.bf16.mxu1 %v3170_v45  ;;  %v3231_v44 = vld [vmem:[#allocation5 + $0x2a8] ss:$16 sps:$4 sm:$0xff]   ;;  %v85_v45 = vld [vmem:[#allocation3 + $0x120] sm:$0xff]  ;;  %v139_v38 = vld [vmem:[#allocation3 + $0x2d0] sm:$0xff] }
  0x54   :  { %1390 = vmatpush1.bf16.msra.mxu0 %v3172_v47  ;;  %1729 = vmatpush1.bf16.msra.mxu1 %v3173_v48  ;;  %v3236_v47 = vld [vmem:[#allocation5 + $0x2c4] ss:$16 sps:$4 sm:$0xff]   ;;  %v3239_v48 = vld [vmem:[#allocation5 + $0x2cc] ss:$16 sps:$4 sm:$0xff]  }
  0x55   :  { %1391 = vmatprep.subr.bf16.mxu0 %v3174_v50  ;;  %1730 = vmatprep.subr.bf16.mxu1 %v3176_v52  ;;  %v163_v50 = vpack.c.bf16 %v91_v46, %v85_v45  ;;  %v104_v52 = vld [vmem:[#allocation3 + $0x1b8] sm:$0xff]  ;;  %v58_v45 = vld [vmem:[#allocation3 + $0x48] sm:$0xff]  ;;  %v3290_v46 = vld [vmem:[#allocation5 + $0x3e4] ss:$16 sps:$4 sm:$0xff]  }
  0x58   :  { %1392 = vmatpush1.bf16.msra.mxu0 %v3178_v53  ;;  %1731 = vmatpush1.bf16.msra.mxu1 %v3179_v54  ;;  %v3237_v53 = vld [vmem:[#allocation5 + $0x2c8] ss:$16 sps:$4 sm:$0xff]   ;;  %v3242_v54 = vld [vmem:[#allocation5 + $0x2e4] ss:$16 sps:$4 sm:$0xff]  }
  0x59   :  { %1393 = vmatprep.subr.bf16.mxu0 %v3180_v55  ;;  %1732 = vmatprep.subr.bf16.mxu1 %v3182_v56  ;;  %v3245_v55 = vld [vmem:[#allocation5 + $0x2ec] ss:$16 sps:$4 sm:$0xff]   ;;  %v3240_v56 = vld [vmem:[#allocation5 + $0x2e0] ss:$16 sps:$4 sm:$0xff]  }
  0x5c   :  { %1394 = vmatpush1.bf16.msra.mxu0 %v3184_v57  ;;  %1733 = vmatpush1.bf16.msra.mxu1 %v3185_v58  ;;  %v3243_v57 = vld [vmem:[#allocation5 + $0x2e8] ss:$16 sps:$4 sm:$0xff]   ;;  %v170_v58 = vpack.c.bf16 %v104_v52, %v98_v51  ;;  %v51_v51 = vld [vmem:[#allocation3 + $0x10] sm:$0xff]  ;;  %v57_v52 = vld [vmem:[#allocation3 + $0x40] sm:$0xff] }
  0x5d   :  { %1395 = vmatprep.subr.bf16.mxu0 %v3186_v59  ;;  %1734 = vmatprep.subr.bf16.mxu1 %v3188_v60  ;;  %v97_v59 = vld [vmem:[#allocation3 + $0x180] sm:$0xff]  ;;  %v103_v60 = vld [vmem:[#allocation3 + $0x1b0] sm:$0xff] }
  0x60   :  { %1396 = vmatpush1.bf16.msra.mxu0 %v3190_v61  ;;  %1735 = vmatpush1.bf16.msra.mxu1 %v3191_v62  ;;  %v3248_v61 = vld [vmem:[#allocation5 + $0x304] ss:$16 sps:$4 sm:$0xff]   ;;  %v3251_v62 = vld [vmem:[#allocation5 + $0x30c] ss:$16 sps:$4 sm:$0xff]  }
  0x61   :  { %1397 = vmatprep.subr.bf16.mxu0 %v3192_v63  ;;  %1736 = vmatprep.subr.bf16.mxu1 %v3194_v0  ;;  %v169_v63 = vpack.c.bf16 %v103_v60, %v97_v59  ;;  %v110_v0 = vld [vmem:[#allocation3 + $0x1e8] sm:$0xff]  ;;  %v3302_v60 = vld [vmem:[#allocation5 + $0x424] ss:$16 sps:$4 sm:$0xff]  }
  0x62   :  { %v3297_v59 = vld [vmem:[#allocation5 + $0x408] ss:$16 sps:$4 sm:$0xff]  }
  0x64   :  { %1398 = vmatpush1.bf16.msra.mxu0 %v3196_v1  ;;  %1737 = vmatpush1.bf16.msra.mxu1 %v3197_v2  ;;  %v116_v1 = vld [vmem:[#allocation3 + $0x218] sm:$0xff]  ;;  %v3246_v2 = vld [vmem:[#allocation5 + $0x300] ss:$16 sps:$4 sm:$0xff]  }
  0x65   :  { %1480 = vmatprep.subr.bf16.mxu0 %v3200_v5  ;;  %1819 = vmatprep.subr.bf16.mxu1 %v3203_v6  ;;  %v3257_v5 = vld [vmem:[#allocation5 + $0x32c] ss:$16 sps:$4 sm:$0xff]   ;;  %v3252_v6 = vld [vmem:[#allocation5 + $0x320] ss:$16 sps:$4 sm:$0xff]  }
  0x67   :  { %1400 = vmatmul.mubr.bf16.vlgmr.msra.gmra.mrb[0].mxu0 %v145_v8  ;;  %1739 = vmatmul.mubr.bf16.vlgmr.msra.gmra.mrb[0].mxu1 %v145_v8  ;;  %v176_v8 = vpack.c.bf16 %v116_v1, %v110_v0  ;;  %v63_v1 = vld [vmem:[#allocation3 + $0x70] sm:$0xff] }
  0x68   :  { %1481 = vmatpush1.bf16.msra.mxu0 %v3198_v7  ;;  %1820 = vmatpush1.bf16.msra.mxu1 %v3201_v9  ;;  %v3255_v7 = vld [vmem:[#allocation5 + $0x328] ss:$16 sps:$4 sm:$0xff]   ;;  %v109_v9 = vld [vmem:[#allocation3 + $0x1e0] sm:$0xff] }
  0x69   :  { %1482 = vmatprep.subr.bf16.mxu0 %v3206_v12  ;;  %1821 = vmatprep.subr.bf16.mxu1 %v3209_v13  ;;  %v3263_v12 = vld [vmem:[#allocation5 + $0x34c] ss:$16 sps:$4 sm:$0xff]   ;;  %v3258_v13 = vld [vmem:[#allocation5 + $0x340] ss:$16 sps:$4 sm:$0xff]  }
  0x6a   :  { %1409 = vmatprep.mubr.bf16.mxu0 %v152_v15  ;;  %1748 = vmatprep.mubr.bf16.mxu1 %v152_v15  ;;  %v3261_v15 = vld [vmem:[#allocation5 + $0x348] ss:$16 sps:$4 sm:$0xff]  }
  0x6c   :  { %1483 = vmatpush1.bf16.msra.mxu0 %v3204_v14  ;;  %1822 = vmatpush1.bf16.msra.mxu1 %v3207_v16  ;;  %v175_v14 = vpack.c.bf16 %v115_v10, %v109_v9  ;;  %v122_v16 = vld [vmem:[#allocation3 + $0x248] sm:$0xff]  ;;  %v3314_v10 = vld [vmem:[#allocation5 + $0x464] ss:$16 sps:$4 sm:$0xff]  }
  0x6d   :  { %1484 = vmatprep.subr.bf16.mxu0 %v3212_v19  ;;  %1823 = vmatprep.subr.bf16.mxu1 %v3215_v20  ;;  %v3269_v19 = vld [vmem:[#allocation5 + $0x36c] ss:$16 sps:$4 sm:$0xff]   ;;  %v3264_v20 = vld [vmem:[#allocation5 + $0x360] ss:$16 sps:$4 sm:$0xff]   ;;  %v3309_v9 = vld [vmem:[#allocation5 + $0x448] ss:$16 sps:$4 sm:$0xff]  }
  0x6f   :  { %1410 = vmatmul.mubr.bf16.gmra.mrb[4].mxu0 %v151_v23  ;;  %1749 = vmatmul.mubr.bf16.gmra.mrb[4].mxu1 %v151_v23  ;;  %v121_v23 = vld [vmem:[#allocation3 + $0x240] sm:$0xff] }
  0x70   :  { %1485 = vmatpush1.bf16.msra.mxu0 %v3210_v21  ;;  %1824 = vmatpush1.bf16.msra.mxu1 %v3213_v22  ;;  %v182_v21 = vpack.c.bf16 %v128_v17, %v122_v16  ;;  %v3267_v22 = vld [vmem:[#allocation5 + $0x368] ss:$16 sps:$4 sm:$0xff]   ;;  %v81_v16 = vld [vmem:[#allocation3 + $0x100] sm:$0xff] }
  0x71   :  { %1486 = vmatprep.subr.bf16.mxu0 %v3218_v26  ;;  %1825 = vmatprep.subr.bf16.mxu1 %v3221_v27  ;;  %v3275_v26 = vld [vmem:[#allocation5 + $0x38c] ss:$16 sps:$4 sm:$0xff]   ;;  %v3270_v27 = vld [vmem:[#allocation5 + $0x380] ss:$16 sps:$4 sm:$0xff]   ;;  %v3320_v17 = vld [vmem:[#allocation5 + $0x484] ss:$16 sps:$4 sm:$0xff]  }
  0x72   :  { %1419 = vmatprep.mubr.bf16.mxu0 %v158_v28  ;;  %1758 = vmatprep.mubr.bf16.mxu1 %v158_v28  ;;  %v3273_v28 = vld [vmem:[#allocation5 + $0x388] ss:$16 sps:$4 sm:$0xff]  }
  0x74   :  { %1487 = vmatpush1.bf16.msra.mxu0 %v3216_v29  ;;  %1826 = vmatpush1.bf16.msra.mxu1 %v3219_v30  ;;  %v181_v29 = vpack.c.bf16 %v127_v24, %v121_v23  ;;  %v134_v30 = vld [vmem:[#allocation3 + $0x2a8] sm:$0xff]  ;;  %v3326_v24 = vld [vmem:[#allocation5 + $0x4a4] ss:$16 sps:$4 sm:$0xff]  }
  0x75   :  { %1488 = vmatprep.subr.bf16.mxu0 %v3224_v33  ;;  %1827 = vmatprep.subr.bf16.mxu1 %v3227_v34  ;;  %v3281_v33 = vld [vmem:[#allocation5 + $0x3ac] ss:$16 sps:$4 sm:$0xff]   ;;  %v188_v34 = vpack.c.bf16 %v140_v31, %v134_v30  ;;  %v93_v30 = vld [vmem:[#allocation3 + $0x160] sm:$0xff] }
  0x76   :  { %v94_v23 = vld [vmem:[#allocation3 + $0x168] sm:$0xff]  ;;  %v3332_v31 = vld [vmem:[#allocation5 + $0x4c4] ss:$16 sps:$4 sm:$0xff]  }
  0x77   :  { %1420 = vmatmul.mubr.bf16.gmra.mrb[8].mxu0 %v157_v37  ;;  %1759 = vmatmul.mubr.bf16.gmra.mrb[8].mxu1 %v157_v37  ;;  %v133_v37 = vld [vmem:[#allocation3 + $0x2a0] sm:$0xff] }
  0x78   :  { %1489 = vmatpush1.bf16.msra.mxu0 %v3222_v35  ;;  %1828 = vmatpush1.bf16.msra.mxu1 %v3225_v36  ;;  %v3276_v35 = vld [vmem:[#allocation5 + $0x3a0] ss:$16 sps:$4 sm:$0xff]   ;;  %v3279_v36 = vld [vmem:[#allocation5 + $0x3a8] ss:$16 sps:$4 sm:$0xff]  }
  0x79   :  { %1490 = vmatprep.subr.bf16.mxu0 %v3230_v40  ;;  %1829 = vmatprep.subr.bf16.mxu1 %v3233_v41  ;;  %v3287_v40 = vld [vmem:[#allocation5 + $0x3cc] ss:$16 sps:$4 sm:$0xff]   ;;  %v3282_v41 = vld [vmem:[#allocation5 + $0x3c0] ss:$16 sps:$4 sm:$0xff]  }
  0x7a   :  { %1429 = vmatprep.mubr.bf16.mxu0 %v164_v43  ;;  %1768 = vmatprep.mubr.bf16.mxu1 %v164_v43  ;;  %v187_v43 = vpack.c.bf16 %v139_v38, %v133_v37  ;;  %v3333_v37 = vld [vmem:[#allocation5 + $0x4c8] ss:$16 sps:$4 sm:$0xff]   ;;  %v3338_v38 = vld [vmem:[#allocation5 + $0x4e4] ss:$16 sps:$4 sm:$0xff]  }
  0x7c   :  { %1491 = vmatpush1.bf16.msra.mxu0 %v3228_v42  ;;  %1830 = vmatpush1.bf16.msra.mxu1 %v3231_v44  ;;  %v3285_v42 = vld [vmem:[#allocation5 + $0x3c8] ss:$16 sps:$4 sm:$0xff]  }
  0x7d   :  { %1492 = vmatprep.subr.bf16.mxu0 %v3236_v47  ;;  %1831 = vmatprep.subr.bf16.mxu1 %v3239_v48  ;;  %v52_v44 = vld [vmem:[#allocation3 + $0x18] sm:$0xff]  ;;  %v3288_v48 = vld [vmem:[#allocation5 + $0x3e0] ss:$16 sps:$4 sm:$0xff]  }
  0x7e   :  { %v3293_v47 = vld [vmem:[#allocation5 + $0x3ec] ss:$16 sps:$4 sm:$0xff]  }
  0x7f   :  { %1430 = vmatmul.mubr.bf16.gmra.mrb[12].mxu0 %v163_v50  ;;  %1769 = vmatmul.mubr.bf16.gmra.mrb[12].mxu1 %v163_v50  ;;  %v3291_v50 = vld [vmem:[#allocation5 + $0x3e8] ss:$16 sps:$4 sm:$0xff]  }
  0x80   :  { %1493 = vmatpush1.bf16.msra.mxu0 %v3234_v49  ;;  %1832 = vmatpush1.bf16.msra.mxu1 %v3237_v53  ;;  %v148_v49 = vpack.c.bf16 %v58_v45, %v52_v44  ;;  %v3296_v53 = vld [vmem:[#allocation5 + $0x404] ss:$16 sps:$4 sm:$0xff]  }
  0x81   :  { %1494 = vmatprep.subr.bf16.mxu0 %v3242_v54  ;;  %1833 = vmatprep.subr.bf16.mxu1 %v3245_v55  ;;  %v3299_v54 = vld [vmem:[#allocation5 + $0x40c] ss:$16 sps:$4 sm:$0xff]   ;;  %v3294_v55 = vld [vmem:[#allocation5 + $0x400] ss:$16 sps:$4 sm:$0xff]   ;;  %v3344_v45 = vld [vmem:[#allocation5 + $0x504] ss:$16 sps:$4 sm:$0xff]  }
  0x82   :  { %1439 = vmatprep.mubr.bf16.mxu0 %v170_v58  ;;  %1778 = vmatprep.mubr.bf16.mxu1 %v170_v58  ;;  %v70_v58 = vld [vmem:[#allocation3 + $0xa8] sm:$0xff]  ;;  %v105_v44 = vld [vmem:[#allocation3 + $0x1c0] sm:$0xff] }
  0x84   :  { %1495 = vmatpush1.bf16.msra.mxu0 %v3240_v56  ;;  %1834 = vmatpush1.bf16.msra.mxu1 %v3243_v57  ;;  %v147_v56 = vpack.c.bf16 %v57_v52, %v51_v51  ;;  %v64_v57 = vld [vmem:[#allocation3 + $0x78] sm:$0xff]  ;;  %v3350_v52 = vld [vmem:[#allocation5 + $0x524] ss:$16 sps:$4 sm:$0xff]  }
  0x85   :  { %1496 = vmatprep.subr.bf16.mxu0 %v3248_v61  ;;  %1835 = vmatprep.subr.bf16.mxu1 %v3251_v62  ;;  %v3305_v61 = vld [vmem:[#allocation5 + $0x42c] ss:$16 sps:$4 sm:$0xff]   ;;  %v3300_v62 = vld [vmem:[#allocation5 + $0x420] ss:$16 sps:$4 sm:$0xff]   ;;  %v154_v0 = vpack.c.bf16 %v70_v58, %v64_v57  ;;  %v3345_v51 = vld [vmem:[#allocation5 + $0x508] ss:$16 sps:$4 sm:$0xff]  }
  0x86   :  { %v111_v57 = vld [vmem:[#allocation3 + $0x1f0] sm:$0xff]  ;;  %v117_v58 = vld [vmem:[#allocation3 + $0x220] sm:$0xff] }
  0x87   :  { %1440 = vmatmul.mubr.bf16.gmra.mrb[16].mxu0 %v169_v63  ;;  %1779 = vmatmul.mubr.bf16.gmra.mrb[16].mxu1 %v169_v63  ;;  %v3303_v63 = vld [vmem:[#allocation5 + $0x428] ss:$16 sps:$4 sm:$0xff]  }
  0x88   :  { %1497 = vmatpush1.bf16.msra.mxu0 %v3246_v2  ;;  %1836 = vmatpush1.bf16.msra.mxu1 %v3249_v3  ;;  %v69_v2 = vld [vmem:[#allocation3 + $0xa0] sm:$0xff] }
  0x89   :  { %1498 = vmatprep.subr.bf16.mxu0 %v3254_v4  ;;  %1837 = vmatprep.subr.bf16.mxu1 %v3257_v5  ;;  %v3308_v3 = vld [vmem:[#allocation5 + $0x444] ss:$16 sps:$4 sm:$0xff]   ;;  %v3311_v4 = vld [vmem:[#allocation5 + $0x44c] ss:$16 sps:$4 sm:$0xff]   ;;  %v153_v5 = vpack.c.bf16 %v69_v2, %v63_v1  ;;  %v3357_v1 = vld [vmem:[#allocation5 + $0x548] ss:$16 sps:$4 sm:$0xff]  }
  0x8a   :  { %1449 = vmatprep.mubr.bf16.mxu0 %v176_v8  ;;  %1788 = vmatprep.mubr.bf16.mxu1 %v176_v8  ;;  %v3306_v8 = vld [vmem:[#allocation5 + $0x440] ss:$16 sps:$4 sm:$0xff]   ;;  %v3362_v2 = vld [vmem:[#allocation5 + $0x564] ss:$16 sps:$4 sm:$0xff]  }
  0x8c   :  { %1499 = vmatpush1.bf16.msra.mxu0 %v3252_v6  ;;  %1838 = vmatpush1.bf16.msra.mxu1 %v3255_v7  ;;  %v76_v6 = vld [vmem:[#allocation3 + $0xd8] sm:$0xff]  ;;  %v82_v7 = vld [vmem:[#allocation3 + $0x108] sm:$0xff] }
  0x8d   :  { %1500 = vmatprep.subr.bf16.mxu0 %v3260_v11  ;;  %1839 = vmatprep.subr.bf16.mxu1 %v3263_v12  ;;  %v3317_v11 = vld [vmem:[#allocation5 + $0x46c] ss:$16 sps:$4 sm:$0xff]   ;;  %v3312_v12 = vld [vmem:[#allocation5 + $0x460] ss:$16 sps:$4 sm:$0xff]  }
  0x8f   :  { %1450 = vmatmul.mubr.bf16.gmra.mrb[20].mxu0 %v175_v14  ;;  %1789 = vmatmul.mubr.bf16.gmra.mrb[20].mxu1 %v175_v14  ;;  %v160_v14 = vpack.c.bf16 %v82_v7, %v76_v6  ;;  %v3363_v6 = vld [vmem:[#allocation5 + $0x568] ss:$16 sps:$4 sm:$0xff]   ;;  %v123_v7 = vld [vmem:[#allocation3 + $0x250] sm:$0xff] }
  0x90   :  { %1501 = vmatpush1.bf16.msra.mxu0 %v3258_v13  ;;  %1840 = vmatpush1.bf16.msra.mxu1 %v3261_v15  ;;  %v3315_v13 = vld [vmem:[#allocation5 + $0x468] ss:$16 sps:$4 sm:$0xff]   ;;  %v75_v15 = vld [vmem:[#allocation3 + $0xd0] sm:$0xff] }
  0x91   :  { %1502 = vmatprep.subr.bf16.mxu0 %v3266_v18  ;;  %1841 = vmatprep.subr.bf16.mxu1 %v3269_v19  ;;  %v3323_v18 = vld [vmem:[#allocation5 + $0x48c] ss:$16 sps:$4 sm:$0xff]   ;;  %v3318_v19 = vld [vmem:[#allocation5 + $0x480] ss:$16 sps:$4 sm:$0xff]  }
  0x92   :  { %1459 = vmatprep.mubr.bf16.mxu0 %v182_v21  ;;  %1798 = vmatprep.mubr.bf16.mxu1 %v182_v21  ;;  %v3321_v21 = vld [vmem:[#allocation5 + $0x488] ss:$16 sps:$4 sm:$0xff]  }
  0x94   :  { %1503 = vmatpush1.bf16.msra.mxu0 %v3264_v20  ;;  %1842 = vmatpush1.bf16.msra.mxu1 %v3267_v22  ;;  %v159_v20 = vpack.c.bf16 %v81_v16, %v75_v15  ;;  %v88_v22 = vld [vmem:[#allocation3 + $0x138] sm:$0xff]  ;;  %v3374_v16 = vld [vmem:[#allocation5 + $0x5a4] ss:$16 sps:$4 sm:$0xff]  }
  0x95   :  { %1504 = vmatprep.subr.bf16.mxu0 %v3272_v25  ;;  %1843 = vmatprep.subr.bf16.mxu1 %v3275_v26  ;;  %v3329_v25 = vld [vmem:[#allocation5 + $0x4ac] ss:$16 sps:$4 sm:$0xff]   ;;  %v3324_v26 = vld [vmem:[#allocation5 + $0x4a0] ss:$16 sps:$4 sm:$0xff]   ;;  %v3369_v15 = vld [vmem:[#allocation5 + $0x588] ss:$16 sps:$4 sm:$0xff]  }
  0x97   :  { %1460 = vmatmul.mubr.bf16.gmra.mrb[24].mxu0 %v181_v29  ;;  %1799 = vmatmul.mubr.bf16.gmra.mrb[24].mxu1 %v181_v29  ;;  %v87_v29 = vld [vmem:[#allocation3 + $0x130] sm:$0xff] }
  0x98   :  { %1505 = vmatpush1.bf16.msra.mxu0 %v3270_v27  ;;  %1844 = vmatpush1.bf16.msra.mxu1 %v3273_v28  ;;  %v166_v27 = vpack.c.bf16 %v94_v23, %v88_v22  ;;  %v3327_v28 = vld [vmem:[#allocation5 + $0x4a8] ss:$16 sps:$4 sm:$0xff]   ;;  %v141_v22 = vld [vmem:[#allocation3 + $0x2e0] sm:$0xff] }
  0x99   :  { %1506 = vmatprep.subr.bf16.mxu0 %v3278_v32  ;;  %1845 = vmatprep.subr.bf16.mxu1 %v3281_v33  ;;  %v3335_v32 = vld [vmem:[#allocation5 + $0x4cc] ss:$16 sps:$4 sm:$0xff]   ;;  %v165_v33 = vpack.c.bf16 %v93_v30, %v87_v29  ;;  %v3380_v23 = vld [vmem:[#allocation5 + $0x5c4] ss:$16 sps:$4 sm:$0xff]   ;;  %v3381_v29 = vld [vmem:[#allocation5 + $0x5c8] ss:$16 sps:$4 sm:$0xff]  }
  0x9a   :  { %1469 = vmatprep.mubr.bf16.mxu0 %v188_v34  ;;  %1808 = vmatprep.mubr.bf16.mxu1 %v188_v34  ;;  %v100_v34 = vld [vmem:[#allocation3 + $0x198] sm:$0xff]  ;;  %v3386_v30 = vld [vmem:[#allocation5 + $0x5e4] ss:$16 sps:$4 sm:$0xff]  }
  0x9c   :  { %1507 = vmatpush1.bf16.msra.mxu0 %v3276_v35  ;;  %1846 = vmatpush1.bf16.msra.mxu1 %v3279_v36  ;;  %v106_v35 = vld [vmem:[#allocation3 + $0x1c8] sm:$0xff]  ;;  %v3330_v36 = vld [vmem:[#allocation5 + $0x4c0] ss:$16 sps:$4 sm:$0xff]  }
  0x9d   :  { %1508 = vmatprep.subr.bf16.mxu0 %v3284_v39  ;;  %1847 = vmatprep.subr.bf16.mxu1 %v3287_v40  ;;  %v3341_v39 = vld [vmem:[#allocation5 + $0x4ec] ss:$16 sps:$4 sm:$0xff]   ;;  %v172_v40 = vpack.c.bf16 %v106_v35, %v100_v34  ;;  %v2157_v35 = vld [vmem:[%s3853_s3 + $0x180] sm:$0xff] }
  0x9e   :  { %v2126_v34 = vld [vmem:[%s3853_s3 + $0x88] sm:$0xff] }
  0x9f   :  { %1470 = vmatmul.mubr.bf16.gmra.mrb[28].mxu0 %v187_v43  ;;  %1809 = vmatmul.mubr.bf16.gmra.mrb[28].mxu1 %v187_v43  ;;  %v99_v43 = vld [vmem:[#allocation3 + $0x190] sm:$0xff] }
  0xa0   :  { %1509 = vmatpush1.bf16.msra.mxu0 %v3282_v41  ;;  %1848 = vmatpush1.bf16.msra.mxu1 %v3285_v42  ;;  %v3336_v41 = vld [vmem:[#allocation5 + $0x4e0] ss:$16 sps:$4 sm:$0xff]   ;;  %v3339_v42 = vld [vmem:[#allocation5 + $0x4e8] ss:$16 sps:$4 sm:$0xff]  }
  0xa1   :  { %1510 = vmatprep.subr.bf16.mxu0 %v3290_v46  ;;  %1849 = vmatprep.subr.bf16.mxu1 %v3293_v47  ;;  %v3347_v46 = vld [vmem:[#allocation5 + $0x50c] ss:$16 sps:$4 sm:$0xff]   ;;  %v171_v47 = vpack.c.bf16 %v105_v44, %v99_v43  ;;  %v2109_v44 = vld [vmem:[%s3853_s3] sm:$0xff] }
  0xa2   :  { %1512 = vmatprep.mubr.bf16.mxu0 %v148_v49  ;;  %1851 = vmatprep.mubr.bf16.mxu1 %v148_v49  ;;  %v118_v49 = vld [vmem:[#allocation3 + $0x228] sm:$0xff] }
  0xa4   :  { %1511 = vmatpush1.bf16.msra.mxu0 %v3288_v48  ;;  %1850 = vmatpush1.bf16.msra.mxu1 %v3291_v50  ;;  %v112_v48 = vld [vmem:[#allocation3 + $0x1f8] sm:$0xff]  ;;  %v3342_v50 = vld [vmem:[#allocation5 + $0x500] ss:$16 sps:$4 sm:$0xff]  }
  0xa5   :  { %1593 = vmatprep.subr.bf16.mxu0 %v3296_v53  ;;  %1932 = vmatprep.subr.bf16.mxu1 %v3299_v54  ;;  %v3353_v53 = vld [vmem:[#allocation5 + $0x52c] ss:$16 sps:$4 sm:$0xff]   ;;  %v178_v54 = vpack.c.bf16 %v118_v49, %v112_v48  ;;  %v2127_v49 = vld [vmem:[%s3853_s3 + $0x90] sm:$0xff] }
  0xa6   :  { %v2142_v48 = vld [vmem:[%s3853_s3 + $0x108] sm:$0xff] }
  0xa7   :  { %1513 = vmatmul.mubr.bf16.vlgmr.msra.gmra.mrb[0].mxu0 %v147_v56  ;;  %1852 = vmatmul.mubr.bf16.vlgmr.msra.gmra.mrb[0].mxu1 %v147_v56  ;;  %v3351_v56 = vld [vmem:[#allocation5 + $0x528] ss:$16 sps:$4 sm:$0xff]  }
  0xa8   :  { %1594 = vmatpush1.bf16.msra.mxu0 %v3294_v55  ;;  %1933 = vmatpush1.bf16.msra.mxu1 %v3297_v59  ;;  %v3348_v55 = vld [vmem:[#allocation5 + $0x520] ss:$16 sps:$4 sm:$0xff]   ;;  %v3356_v59 = vld [vmem:[#allocation5 + $0x544] ss:$16 sps:$4 sm:$0xff]  }
  0xa9   :  { %1595 = vmatprep.subr.bf16.mxu0 %v3302_v60  ;;  %1934 = vmatprep.subr.bf16.mxu1 %v3305_v61  ;;  %v3359_v60 = vld [vmem:[#allocation5 + $0x54c] ss:$16 sps:$4 sm:$0xff]   ;;  %v177_v61 = vpack.c.bf16 %v117_v58, %v111_v57  ;;  %v2111_v57 = vld [vmem:[%s3853_s3 + $0x10] sm:$0xff] }
  0xaa   :  { %1522 = vmatprep.mubr.bf16.mxu0 %v154_v0  ;;  %1861 = vmatprep.mubr.bf16.mxu1 %v154_v0  ;;  %v3354_v0 = vld [vmem:[#allocation5 + $0x540] ss:$16 sps:$4 sm:$0xff]   ;;  %v2112_v58 = vld [vmem:[%s3853_s3 + $0x18] sm:$0xff] }
  0xac   :  { %1596 = vmatpush1.bf16.msra.mxu0 %v3300_v62  ;;  %1935 = vmatpush1.bf16.msra.mxu1 %v3303_v63  ;;  %v124_v62 = vld [vmem:[#allocation3 + $0x258] sm:$0xff]  ;;  %v130_v63 = vld [vmem:[#allocation3 + $0x288] sm:$0xff] }
  0xad   :  { %1597 = vmatprep.subr.bf16.mxu0 %v3308_v3  ;;  %1936 = vmatprep.subr.bf16.mxu1 %v3311_v4  ;;  %v3365_v3 = vld [vmem:[#allocation5 + $0x56c] ss:$16 sps:$4 sm:$0xff]   ;;  %v184_v4 = vpack.c.bf16 %v130_v63, %v124_v62  ;;  %v2129_v63 = vld [vmem:[%s3853_s3 + $0xa0] sm:$0xff] }
  0xae   :  { %v2144_v62 = vld [vmem:[%s3853_s3 + $0x118] sm:$0xff] }
  0xaf   :  { %1523 = vmatmul.mubr.bf16.gmra.mrb[4].mxu0 %v153_v5  ;;  %1862 = vmatmul.mubr.bf16.gmra.mrb[4].mxu1 %v153_v5  ;;  %v3360_v5 = vld [vmem:[#allocation5 + $0x560] ss:$16 sps:$4 sm:$0xff]  }
  0xb0   :  { %1598 = vmatpush1.bf16.msra.mxu0 %v3306_v8  ;;  %1937 = vmatpush1.bf16.msra.mxu1 %v3309_v9  ;;  %v129_v8 = vld [vmem:[#allocation3 + $0x280] sm:$0xff] }
  0xb1   :  { %1599 = vmatprep.subr.bf16.mxu0 %v3314_v10  ;;  %1938 = vmatprep.subr.bf16.mxu1 %v3317_v11  ;;  %v3368_v9 = vld [vmem:[#allocation5 + $0x584] ss:$16 sps:$4 sm:$0xff]   ;;  %v3371_v10 = vld [vmem:[#allocation5 + $0x58c] ss:$16 sps:$4 sm:$0xff]   ;;  %v183_v11 = vpack.c.bf16 %v129_v8, %v123_v7  ;;  %v2846_v7 = vpack.c.bf16 %v2112_v58, %v2111_v57 }
  0xb2   :  { %1532 = vmatprep.mubr.bf16.mxu0 %v160_v14  ;;  %1871 = vmatprep.mubr.bf16.mxu1 %v160_v14  ;;  %v3366_v14 = vld [vmem:[#allocation5 + $0x580] ss:$16 sps:$4 sm:$0xff]   ;;  %v2152_v58 = vld [vmem:[%s3853_s3 + $0x158] sm:$0xff] }
  0xb3   :  { %v2151_v57 = vld [vmem:[%s3853_s3 + $0x150] sm:$0xff] }
  0xb4   :  { %1600 = vmatpush1.bf16.msra.mxu0 %v3312_v12  ;;  %1939 = vmatpush1.bf16.msra.mxu1 %v3315_v13  ;;  %v136_v12 = vld [vmem:[#allocation3 + $0x2b8] sm:$0xff]  ;;  %v142_v13 = vld [vmem:[#allocation3 + $0x2e8] sm:$0xff] }
  0xb5   :  { %1601 = vmatprep.subr.bf16.mxu0 %v3320_v17  ;;  %1940 = vmatprep.subr.bf16.mxu1 %v3323_v18  ;;  %v3377_v17 = vld [vmem:[#allocation5 + $0x5ac] ss:$16 sps:$4 sm:$0xff]   ;;  %v190_v18 = vpack.c.bf16 %v142_v13, %v136_v12  ;;  %v2145_v13 = vld [vmem:[%s3853_s3 + $0x120] sm:$0xff] }
  0xb7   :  { %1533 = vmatmul.mubr.bf16.gmra.mrb[8].mxu0 %v159_v20  ;;  %1872 = vmatmul.mubr.bf16.gmra.mrb[8].mxu1 %v159_v20  ;;  %v3375_v20 = vld [vmem:[#allocation5 + $0x5a8] ss:$16 sps:$4 sm:$0xff]  }
  0xb8   :  { %1602 = vmatpush1.bf16.msra.mxu0 %v3318_v19  ;;  %1941 = vmatpush1.bf16.msra.mxu1 %v3321_v21  ;;  %v3372_v19 = vld [vmem:[#allocation5 + $0x5a0] ss:$16 sps:$4 sm:$0xff]  }
  0xb9   :  { %1603 = vmatprep.subr.bf16.mxu0 %v3326_v24  ;;  %1942 = vmatprep.subr.bf16.mxu1 %v3329_v25  ;;  %v135_v21 = vld [vmem:[#allocation3 + $0x2b0] sm:$0xff]  ;;  %v3383_v24 = vld [vmem:[#allocation5 + $0x5cc] ss:$16 sps:$4 sm:$0xff]  }
  0xba   :  { %1542 = vmatprep.mubr.bf16.mxu0 %v166_v27  ;;  %1881 = vmatprep.mubr.bf16.mxu1 %v166_v27  ;;  %v189_v25 = vpack.c.bf16 %v141_v22, %v135_v21  ;;  %v60_v27 = vld [vmem:[#allocation3 + $0x58] sm:$0xff] }
  0xbc   :  { %1604 = vmatpush1.bf16.msra.mxu0 %v3324_v26  ;;  %1943 = vmatpush1.bf16.msra.mxu1 %v3327_v28  ;;  %v54_v26 = vld [vmem:[#allocation3 + $0x28] sm:$0xff]  ;;  %v3378_v28 = vld [vmem:[#allocation5 + $0x5c0] ss:$16 sps:$4 sm:$0xff]  }
  0xbd   :  { %1605 = vmatprep.subr.bf16.mxu0 %v3332_v31  ;;  %1944 = vmatprep.subr.bf16.mxu1 %v3335_v32  ;;  %v3389_v31 = vld [vmem:[#allocation5 + $0x5ec] ss:$16 sps:$4 sm:$0xff]   ;;  %v2125_v32 = vld [vmem:[%s3853_s3 + $0x80] sm:$0xff] }
  0xbe   :  { %v2840_v43 = vpack.c.bf16 %v2126_v34, %v2125_v32  ;;  %v2166_v32 = vld [vmem:[%s3853_s3 + $0x1c8] sm:$0xff]  ;;  %v83_v34 = vld [vmem:[#allocation3 + $0x110] sm:$0xff] }
  0xbf   :  { %1543 = vmatmul.mubr.bf16.gmra.mrb[12].mxu0 %v165_v33  ;;  %1882 = vmatmul.mubr.bf16.gmra.mrb[12].mxu1 %v165_v33  ;;  %v150_v33 = vpack.c.bf16 %v60_v27, %v54_v26  ;;  %v2147_v27 = vld [vmem:[%s3853_s3 + $0x130] sm:$0xff] }
  0xc0   :  { %1606 = vmatpush1.bf16.msra.mxu0 %v3330_v36  ;;  %1945 = vmatpush1.bf16.msra.mxu1 %v3333_v37  ;;  %v2158_v36 = vld [vmem:[%s3853_s3 + $0x188] sm:$0xff]  ;;  %v3384_v37 = vld [vmem:[#allocation5 + $0x5e0] ss:$16 sps:$4 sm:$0xff]  }
  0xc1   :  { %1607 = vmatprep.subr.bf16.mxu0 %v3338_v38  ;;  %1946 = vmatprep.subr.bf16.mxu1 %v3341_v39  ;;  %v3387_v38 = vld [vmem:[#allocation5 + $0x5e8] ss:$16 sps:$4 sm:$0xff]   ;;  %v53_v39 = vld [vmem:[#allocation3 + $0x20] sm:$0xff] }
  0xc2   :  { %1552 = vmatprep.mubr.bf16.mxu0 %v172_v40  ;;  %1891 = vmatprep.mubr.bf16.mxu1 %v172_v40  ;;  %v59_v40 = vld [vmem:[#allocation3 + $0x50] sm:$0xff] }
  0xc4   :  { %1608 = vmatpush1.bf16.msra.mxu0 %v3336_v41  ;;  %1947 = vmatpush1.bf16.msra.mxu1 %v3339_v42  ;;  %v66_v41 = vld [vmem:[#allocation3 + $0x88] sm:$0xff]  ;;  %v72_v42 = vld [vmem:[#allocation3 + $0xb8] sm:$0xff] }
  0xc5   :  { %1609 = vmatprep.subr.bf16.mxu0 %v3344_v45  ;;  %1948 = vmatprep.subr.bf16.mxu1 %v3347_v46  ;;  %v2110_v45 = vld [vmem:[%s3853_s3 + $0x8] sm:$0xff]  ;;  %v2872_v46 = vpack.c.bf16 %v2158_v36, %v2157_v35  ;;  %v96_v36 = vld [vmem:[#allocation3 + $0x178] sm:$0xff] }
  0xc6   :  { %v90_v35 = vld [vmem:[#allocation3 + $0x148] sm:$0xff] }
  0xc7   :  { %1553 = vmatmul.mubr.bf16.gmra.mrb[16].mxu0 %v171_v47  ;;  %1892 = vmatmul.mubr.bf16.gmra.mrb[16].mxu1 %v171_v47  ;;  %v2141_v47 = vld [vmem:[%s3853_s3 + $0x100] sm:$0xff] }
  0xc8   :  { %1610 = vmatpush1.bf16.msra.mxu0 %v3342_v50  ;;  %1949 = vmatpush1.bf16.msra.mxu1 %v3345_v51  ;;  %v149_v50 = vpack.c.bf16 %v59_v40, %v53_v39  ;;  %v2128_v51 = vld [vmem:[%s3853_s3 + $0x98] sm:$0xff]  ;;  %v2117_v39 = vld [vmem:[%s3853_s3 + $0x40] sm:$0xff]  ;;  %v2118_v40 = vld [vmem:[%s3853_s3 + $0x48] sm:$0xff] }
  0xc9   :  { %1611 = vmatprep.subr.bf16.mxu0 %v3350_v52  ;;  %1950 = vmatprep.subr.bf16.mxu1 %v3353_v53  ;;  %v2159_v52 = vld [vmem:[%s3853_s3 + $0x190] sm:$0xff]  ;;  %v2160_v53 = vld [vmem:[%s3853_s3 + $0x198] sm:$0xff] }
  0xca   :  { %1562 = vmatprep.mubr.bf16.mxu0 %v178_v54  ;;  %1901 = vmatprep.mubr.bf16.mxu1 %v178_v54  ;;  %v156_v54 = vpack.c.bf16 %v72_v42, %v66_v41 }
  0xcc   :  { %1612 = vmatpush1.bf16.msra.mxu0 %v3348_v55  ;;  %1951 = vmatpush1.bf16.msra.mxu1 %v3351_v56  ;;  %v2842_v55 = vpack.c.bf16 %v2110_v45, %v2109_v44  ;;  %v2874_v56 = vpack.c.bf16 %v2142_v48, %v2141_v47  ;;  %v2150_v44 = vld [vmem:[%s3853_s3 + $0x148] sm:$0xff]  ;;  %v2135_v45 = vld [vmem:[%s3853_s3 + $0xd0] sm:$0xff]  ;;  %v2136_v47 = vld [vmem:[%s3853_s3 + $0xd8] sm:$0xff] }
  0xcd   :  { %1613 = vmatprep.subr.bf16.mxu0 %v3356_v59  ;;  %1952 = vmatprep.subr.bf16.mxu1 %v3359_v60  ;;  %v2844_v59 = vpack.c.bf16 %v2128_v51, %v2127_v49  ;;  %v2876_v60 = vpack.c.bf16 %v2160_v53, %v2159_v52  ;;  %v2167_v48 = vld [vmem:[%s3853_s3 + $0x1d0] sm:$0xff]  ;;  %v2168_v49 = vld [vmem:[%s3853_s3 + $0x1d8] sm:$0xff]  ;;  %v2858_v51 = vpack.c.bf16 %v2118_v40, %v2117_v39 }
  0xce   :  { %v2119_v53 = vld [vmem:[%s3853_s3 + $0x50] sm:$0xff]  ;;  %v2172_v40 = vld [vmem:[%s3853_s3 + $0x1f8] sm:$0xff] }
  0xcf   :  { %1563 = vmatmul.mubr.bf16.gmra.mrb[20].mxu0 %v177_v61  ;;  %1902 = vmatmul.mubr.bf16.gmra.mrb[20].mxu1 %v177_v61  ;;  %v2143_v61 = vld [vmem:[%s3853_s3 + $0x110] sm:$0xff] }
  0xd0   :  { %1614 = vmatpush1.bf16.msra.mxu0 %v3354_v0  ;;  %1953 = vmatpush1.bf16.msra.mxu1 %v3357_v1  ;;  %v2130_v0 = vld [vmem:[%s3853_s3 + $0xa8] sm:$0xff]  ;;  %v2161_v1 = vld [vmem:[%s3853_s3 + $0x1a0] sm:$0xff]  ;;  %v2878_v8 = vpack.c.bf16 %v2144_v62, %v2143_v61  ;;  %v2171_v39 = vld [vmem:[%s3853_s3 + $0x1f0] sm:$0xff] }
  0xd1   :  { %1615 = vmatprep.subr.bf16.mxu0 %v3362_v2  ;;  %1954 = vmatprep.subr.bf16.mxu1 %v3365_v3  ;;  %v2162_v2 = vld [vmem:[%s3853_s3 + $0x1a8] sm:$0xff]  ;;  %v65_v3 = vld [vmem:[#allocation3 + $0x80] sm:$0xff] }
  0xd2   :  { %1572 = vmatprep.mubr.bf16.mxu0 %v184_v4  ;;  %1911 = vmatprep.mubr.bf16.mxu1 %v184_v4  ;;  %v71_v4 = vld [vmem:[#allocation3 + $0xb0] sm:$0xff]  ;;  %v2880_v12 = vpack.c.bf16 %v2162_v2, %v2161_v1  ;;  %v2169_v61 = vld [vmem:[%s3853_s3 + $0x1e0] sm:$0xff]  ;;  %v2170_v62 = vld [vmem:[%s3853_s3 + $0x1e8] sm:$0xff] }
  0xd3   :  { %v102_v1 = vld [vmem:[#allocation3 + $0x1a8] sm:$0xff]  ;;  %v108_v2 = vld [vmem:[#allocation3 + $0x1d8] sm:$0xff] }
  0xd4   :  { %1616 = vmatpush1.bf16.msra.mxu0 %v3360_v5  ;;  %1955 = vmatpush1.bf16.msra.mxu1 %v3363_v6  ;;  %v78_v5 = vld [vmem:[#allocation3 + $0xe8] sm:$0xff]  ;;  %v84_v6 = vld [vmem:[#allocation3 + $0x118] sm:$0xff] }
  0xd5   :  { %1617 = vmatprep.subr.bf16.mxu0 %v3368_v9  ;;  %1956 = vmatprep.subr.bf16.mxu1 %v3371_v10  ;;  %v2113_v9 = vld [vmem:[%s3853_s3 + $0x20] sm:$0xff]  ;;  %v2114_v10 = vld [vmem:[%s3853_s3 + $0x28] sm:$0xff] }
  0xd6   :  { %v2850_v21 = vpack.c.bf16 %v2114_v10, %v2113_v9  ;;  %v2153_v9 = vld [vmem:[%s3853_s3 + $0x160] sm:$0xff]  ;;  %v2154_v10 = vld [vmem:[%s3853_s3 + $0x168] sm:$0xff] }
  0xd7   :  { %1573 = vmatmul.mubr.bf16.gmra.mrb[24].mxu0 %v183_v11  ;;  %1912 = vmatmul.mubr.bf16.gmra.mrb[24].mxu1 %v183_v11  ;;  %v2848_v11 = vpack.c.bf16 %v2130_v0, %v2129_v63  ;;  %v89_v63 = vld [vmem:[#allocation3 + $0x140] sm:$0xff]  ;;  %v95_v0 = vld [vmem:[#allocation3 + $0x170] sm:$0xff] }
  0xd8   :  { %1618 = vmatpush1.bf16.msra.mxu0 %v3366_v14  ;;  %1957 = vmatpush1.bf16.msra.mxu1 %v3369_v15  ;;  %v2146_v14 = vld [vmem:[%s3853_s3 + $0x128] sm:$0xff]  ;;  %v2131_v15 = vld [vmem:[%s3853_s3 + $0xb0] sm:$0xff] }
  0xd9   :  { %1619 = vmatprep.subr.bf16.mxu0 %v3374_v16  ;;  %1958 = vmatprep.subr.bf16.mxu1 %v3377_v17  ;;  %v155_v16 = vpack.c.bf16 %v71_v4, %v65_v3  ;;  %v2132_v17 = vld [vmem:[%s3853_s3 + $0xb8] sm:$0xff]  ;;  %v2882_v22 = vpack.c.bf16 %v2146_v14, %v2145_v13  ;;  %v2894_v4 = vpack.c.bf16 %v2152_v58, %v2151_v57 }
  0xda   :  { %1582 = vmatprep.mubr.bf16.mxu0 %v190_v18  ;;  %1921 = vmatprep.mubr.bf16.mxu1 %v190_v18  ;;  %v2163_v18 = vld [vmem:[%s3853_s3 + $0x1b0] sm:$0xff]  ;;  %v2140_v13 = vld [vmem:[%s3853_s3 + $0xf8] sm:$0xff]  ;;  %v174_v14 = vpack.c.bf16 %v108_v2, %v102_v1 }
  0xdc   :  { %1620 = vmatpush1.bf16.msra.mxu0 %v3372_v19  ;;  %1959 = vmatpush1.bf16.msra.mxu1 %v3375_v20  ;;  %v2164_v19 = vld [vmem:[%s3853_s3 + $0x1b8] sm:$0xff]  ;;  %v162_v20 = vpack.c.bf16 %v84_v6, %v78_v5  ;;  %v2121_v5 = vld [vmem:[%s3853_s3 + $0x60] sm:$0xff] }
  0xdd   :  { %1621 = vmatprep.subr.bf16.mxu0 %v3380_v23  ;;  %1960 = vmatprep.subr.bf16.mxu1 %v3383_v24  ;;  %v2115_v23 = vld [vmem:[%s3853_s3 + $0x30] sm:$0xff]  ;;  %v2116_v24 = vld [vmem:[%s3853_s3 + $0x38] sm:$0xff]  ;;  %v2884_v26 = vpack.c.bf16 %v2164_v19, %v2163_v18  ;;  %v101_v18 = vld [vmem:[#allocation3 + $0x1a0] sm:$0xff] }
  0xde   :  { %v107_v19 = vld [vmem:[#allocation3 + $0x1d0] sm:$0xff] }
  0xdf   :  { %1583 = vmatmul.mubr.bf16.gmra.mrb[28].mxu0 %v189_v25  ;;  %1922 = vmatmul.mubr.bf16.gmra.mrb[28].mxu1 %v189_v25  ;;  %v2852_v25 = vpack.c.bf16 %v2132_v17, %v2131_v15 }
  0xe0   :  { %1622 = vmatpush1.bf16.msra.mxu0 %v3378_v28  ;;  %1961 = vmatpush1.bf16.msra.mxu1 %v3381_v29  ;;  %v2148_v28 = vld [vmem:[%s3853_s3 + $0x138] sm:$0xff]  ;;  %v2133_v29 = vld [vmem:[%s3853_s3 + $0xc0] sm:$0xff] }
  0xe1   :  { %1623 = vmatprep.subr.bf16.mxu0 %v3386_v30  ;;  %1962 = vmatprep.subr.bf16.mxu1 %v3389_v31  ;;  %v2134_v30 = vld [vmem:[%s3853_s3 + $0xc8] sm:$0xff]  ;;  %v2165_v31 = vld [vmem:[%s3853_s3 + $0x1c0] sm:$0xff] }
  0xe2   :  { %1625 = vmatprep.mubr.bf16.mxu0 %v150_v33  ;;  %1964 = vmatprep.mubr.bf16.mxu1 %v150_v33  ;;  %v77_v33 = vld [vmem:[#allocation3 + $0xe0] sm:$0xff]  ;;  %v2856_v41 = vpack.c.bf16 %v2134_v30, %v2133_v29  ;;  %v2888_v42 = vpack.c.bf16 %v2166_v32, %v2165_v31  ;;  %v131_v31 = vld [vmem:[#allocation3 + $0x290] sm:$0xff]  ;;  %v138_v32 = vld [vmem:[#allocation3 + $0x2c8] sm:$0xff] }
  0xe3   :  { %v125_v30 = vld [vmem:[#allocation3 + $0x260] sm:$0xff] }
  0xe4   :  { %1624 = vmatpush1.bf16.msra.mxu0 %v3384_v37  ;;  %1963 = vmatpush1.bf16.msra.mxu1 %v3387_v38  ;;  %v2854_v37 = vpack.c.bf16 %v2116_v24, %v2115_v23  ;;  %v2886_v38 = vpack.c.bf16 %v2148_v28, %v2147_v27  ;;  %v113_v24 = vld [vmem:[#allocation3 + $0x200] sm:$0xff]  ;;  %v132_v27 = vld [vmem:[#allocation3 + $0x298] sm:$0xff] }
  0xe5   :  { %2841 = vmatprep.subr.bf16.mxu0 %v2840_v43  ;;  %2873 = vmatprep.subr.bf16.mxu1 %v2872_v46  ;;  %v2149_v43 = vld [vmem:[%s3853_s3 + $0x140] sm:$0xff]  ;;  %v161_v46 = vpack.c.bf16 %v83_v34, %v77_v33  ;;  %v144_v33 = vld [vmem:[#allocation3 + $0x2f8] sm:$0xff]  ;;  %v185_v34 = vpack.c.bf16 %v131_v31, %v125_v30 }
  0xe6   :  { %v2890_v52 = vpack.c.bf16 %v2150_v44, %v2149_v43  ;;  %v2900_v43 = vpack.c.bf16 %v2172_v40, %v2171_v39  ;;  %v2155_v44 = vld [vmem:[%s3853_s3 + $0x170] sm:$0xff] }
  0xe7   :  { %1626 = vmatmul.mubr.bf16.vlgmr.msra.gmra.mrb[0].mxu0 %v149_v50  ;;  %1965 = vmatmul.mubr.bf16.vlgmr.msra.gmra.mrb[0].mxu1 %v149_v50  ;;  %v168_v50 = vpack.c.bf16 %v96_v36, %v90_v35  ;;  %v192_v35 = vpack.c.bf16 %v144_v33, %v138_v32  ;;  %v137_v36 = vld [vmem:[#allocation3 + $0x2c0] sm:$0xff] }
  0xe8   :  { %1635 = vmatprep.mubr.bf16.mxu0 %v156_v54  ;;  %1974 = vmatprep.mubr.bf16.mxu1 %v156_v54  ;;  %v2120_v54 = vld [vmem:[%s3853_s3 + $0x58] sm:$0xff] }
  0xe9   :  { %2843 = vmatpush3.bf16.msra.mxu0 %v2842_v55  ;;  %2875 = vmatpush3.bf16.msra.mxu1 %v2874_v56  ;;  %v2860_v55 = vpack.c.bf16 %v2136_v47, %v2135_v45  ;;  %v2892_v56 = vpack.c.bf16 %v2168_v49, %v2167_v48  ;;  %v2862_v3 = vpack.c.bf16 %v2120_v54, %v2119_v53  ;;  %v387_v48 = vlaneseq }
  0xea   :  { %2845 = vmatprep.subr.bf16.mxu0 %v2844_v59  ;;  %2877 = vmatprep.subr.bf16.mxu1 %v2876_v60  ;;  %v2137_v59 = vld [vmem:[%s3853_s3 + $0xe0] sm:$0xff]  ;;  %v2138_v60 = vld [vmem:[%s3853_s3 + $0xe8] sm:$0xff] }
  0xeb   :  { %v2864_v6 = vpack.c.bf16 %v2138_v60, %v2137_v59  ;;  %v388_v49 = vshrl.u32 %v387_v48, 7 }
  0xed   :  { %2847 = vmatpush3.bf16.msra.mxu0 %v2846_v7  ;;  %2879 = vmatpush3.bf16.msra.mxu1 %v2878_v8  ;;  %v2122_v7 = vld [vmem:[%s3853_s3 + $0x68] sm:$0xff]  ;;  %v2896_v8 = vpack.c.bf16 %v2170_v62, %v2169_v61  ;;  %v393_v53 = vsub.s32 1, %v388_v49  ;;  %v401_v54 = vsub.s32 3, %v388_v49 }
  0xee   :  { %2849 = vmatprep.subr.bf16.mxu0 %v2848_v11  ;;  %2881 = vmatprep.subr.bf16.mxu1 %v2880_v12  ;;  %v167_v11 = vpack.c.bf16 %v95_v0, %v89_v63  ;;  %v2139_v12 = vld [vmem:[%s3853_s3 + $0xf0] sm:$0xff]  ;;  %v2866_v15 = vpack.c.bf16 %v2122_v7, %v2121_v5 }
  0xef   :  { %1636 = vmatmul.mubr.bf16.gmra.mrb[4].mxu0 %v155_v16  ;;  %1975 = vmatmul.mubr.bf16.gmra.mrb[4].mxu1 %v155_v16  ;;  %v2898_v16 = vpack.c.bf16 %v2154_v10, %v2153_v9  ;;  %v2868_v17 = vpack.c.bf16 %v2140_v13, %v2139_v12 }
  0xf0   :  { %1645 = vmatprep.mubr.bf16.mxu0 %v162_v20  ;;  %1984 = vmatprep.mubr.bf16.mxu1 %v162_v20  ;;  %v114_v20 = vld [vmem:[#allocation3 + $0x208] sm:$0xff] }
  0xf1   :  { %2851 = vmatpush3.bf16.msra.mxu0 %v2850_v21  ;;  %2883 = vmatpush3.bf16.msra.mxu1 %v2882_v22  ;;  %v120_v21 = vld [vmem:[#allocation3 + $0x238] sm:$0xff]  ;;  %v173_v22 = vpack.c.bf16 %v107_v19, %v101_v18 }
  0xf2   :  { %2853 = vmatprep.subr.bf16.mxu0 %v2852_v25  ;;  %2885 = vmatprep.subr.bf16.mxu1 %v2884_v26  ;;  %v180_v23 = vpack.c.bf16 %v120_v21, %v114_v20  ;;  %v119_v25 = vld [vmem:[#allocation3 + $0x230] sm:$0xff]  ;;  %v126_v26 = vld [vmem:[#allocation3 + $0x268] sm:$0xff] }
  0xf3   :  { %v179_v28 = vpack.c.bf16 %v119_v25, %v113_v24  ;;  %v186_v29 = vpack.c.bf16 %v132_v27, %v126_v26 }
  0xf5   :  { %2855 = vmatpush3.bf16.msra.mxu0 %v2854_v37  ;;  %2887 = vmatpush3.bf16.msra.mxu1 %v2886_v38  ;;  %v143_v37 = vld [vmem:[#allocation3 + $0x2f0] sm:$0xff] }
  0xf6   :  { %2857 = vmatprep.subr.bf16.mxu0 %v2856_v41  ;;  %2889 = vmatprep.subr.bf16.mxu1 %v2888_v42  ;;  %v191_v38 = vpack.c.bf16 %v143_v37, %v137_v36  ;;  %v2123_v41 = vld [vmem:[%s3853_s3 + $0x70] sm:$0xff]  ;;  %v2124_v42 = vld [vmem:[%s3853_s3 + $0x78] sm:$0xff] }
  0xf7   :  { %1646 = vmatmul.mubr.bf16.gmra.mrb[8].mxu0 %v161_v46  ;;  %1985 = vmatmul.mubr.bf16.gmra.mrb[8].mxu1 %v161_v46  ;;  %v2870_v45 = vpack.c.bf16 %v2124_v42, %v2123_v41  ;;  %v2156_v46 = vld [vmem:[%s3853_s3 + $0x178] sm:$0xff] }
  0xf8   :  { %1655 = vmatprep.mubr.bf16.mxu0 %v168_v50  ;;  %1994 = vmatprep.mubr.bf16.mxu1 %v168_v50  ;;  %v2902_v47 = vpack.c.bf16 %v2156_v46, %v2155_v44  ;;  %v389_v50 = vsub.s32 0, %v388_v49 }
  0xf9   :  { %2859 = vmatpush3.bf16.msra.mxu0 %v2858_v51  ;;  %2891 = vmatpush3.bf16.msra.mxu1 %v2890_v52  ;;  %v397_v51 = vsub.s32 2, %v388_v49  ;;  %v385_v52 = vld [vmem:[%s3852_s2] sm:$0xf] }
  0xfa   :  { %2861 = vmatprep.subr.bf16.mxu0 %v2860_v55  ;;  %2893 = vmatprep.subr.bf16.mxu1 %v2892_v56  ;;  %v3693_v55 = vrot.slane %v385_v52, %v389_v50  ;;  %v3697_v57 = vrot.slane %v385_v52, %v393_v53  ;;  %v3699_v58 = vrot.slane %v385_v52, %v401_v54 }
  0xfb   :  { %v3695_v56 = vrot.slane %v385_v52, %v397_v51 }
  0xfd   :  { %2863 = vmatpush3.bf16.msra.mxu0 %v2862_v3  ;;  %2895 = vmatpush3.bf16.msra.mxu1 %v2894_v4 }
  0xfe   :  { %2865 = vmatprep.subr.bf16.mxu0 %v2864_v6  ;;  %2897 = vmatprep.subr.bf16.mxu1 %v2896_v8 }
  0xff   :  { %1656 = vmatmul.mubr.bf16.gmra.mrb[12].mxu0 %v167_v11  ;;  %1995 = vmatmul.mubr.bf16.gmra.mrb[12].mxu1 %v167_v11 }
 0x100   :  { %1665 = vmatprep.mubr.bf16.mxu0 %v174_v14  ;;  %2004 = vmatprep.mubr.bf16.mxu1 %v174_v14 }
 0x101   :  { %2867 = vmatpush3.bf16.msra.mxu0 %v2866_v15  ;;  %2899 = vmatpush3.bf16.msra.mxu1 %v2898_v16 }
 0x102   :  { %2869 = vmatprep.subr.bf16.mxu0 %v2868_v17  ;;  %2901 = vmatprep.subr.bf16.mxu1 %v2900_v43 }
 0x105   :  { %2871 = vmatpush3.bf16.msra.mxu0 %v2870_v45  ;;  %2903 = vmatpush3.bf16.msra.mxu1 %v2902_v47 }
 0x107   :  { %1666 = vmatmul.mubr.bf16.gmra.mrb[16].mxu0 %v173_v22  ;;  %2005 = vmatmul.mubr.bf16.gmra.mrb[16].mxu1 %v173_v22 }
 0x108   :  { %1675 = vmatprep.mubr.bf16.mxu0 %v180_v23  ;;  %2014 = vmatprep.mubr.bf16.mxu1 %v180_v23 }
 0x10f   :  { %1676 = vmatmul.mubr.bf16.gmra.mrb[20].mxu0 %v179_v28  ;;  %2015 = vmatmul.mubr.bf16.gmra.mrb[20].mxu1 %v179_v28 }
 0x110   :  { %1685 = vmatprep.mubr.bf16.mxu0 %v186_v29  ;;  %2024 = vmatprep.mubr.bf16.mxu1 %v186_v29 }
 0x117   :  { %1686 = vmatmul.mubr.bf16.gmra.mrb[24].mxu0 %v185_v34  ;;  %2025 = vmatmul.mubr.bf16.gmra.mrb[24].mxu1 %v185_v34 }
 0x118   :  { %1695 = vmatprep.mubr.bf16.mxu0 %v192_v35  ;;  %2034 = vmatprep.mubr.bf16.mxu1 %v192_v35 }
 0x11f   :  { %1696 = vmatmul.mubr.bf16.gmra.mrb[28].mxu0 %v191_v38  ;;  %2035 = vmatmul.mubr.bf16.gmra.mrb[28].mxu1 %v191_v38 }
 0x1ba   :  { %v1627_v59 = vpop.f32.mrb[0].mxu0  ;;  %v1966_v60 = vpop.f32.mrb[0].mxu1 }
 0x1bb   :  { %v2904_v61 = vadd.f32 %v1627_v59, %v3693_v55  ;;  %v2936_v62 = vadd.f32 %v1966_v60, %v3695_v56  ;;  %v1629_v63 = vpop.f32.mrb[1].mxu0  ;;  %v1968_v0 = vpop.f32.mrb[1].mxu1 }
 0x1bc   :  { %v2905_v1 = vadd.f32 %v1629_v63, %v3697_v57  ;;  %v2937_v2 = vadd.f32 %v1968_v0, %v3699_v58  ;;  %v1631_v3 = vpop.f32.mrb[2].mxu0  ;;  %v1970_v4 = vpop.f32.mrb[2].mxu1 }
 0x1bd   :  { %v1633_v5 = vpop.f32.mrb[3].mxu0  ;;  %v1972_v6 = vpop.f32.mrb[3].mxu1  ;;  %v2045_v11 = vmax.f32 %v2904_v61, 0.0  ;;  %v2047_v12 = vmax.f32 %v2936_v62, 0.0  ;;  %v2906_v13 = vadd.f32 %v1631_v3, %v3693_v55  ;;  %v2938_v14 = vadd.f32 %v1970_v4, %v3695_v56 }
 0x1be   :  { %v2046_v7 = vmax.f32 %v2905_v1, 0.0  ;;  %v2048_v8 = vmax.f32 %v2937_v2, 0.0  ;;  %v2907_v9 = vadd.f32 %v1633_v5, %v3697_v57  ;;  %v2939_v10 = vadd.f32 %v1972_v6, %v3699_v58 }
 0x1bf   :  { %v2049_v19 = vmax.f32 %v2906_v13, 0.0  ;;  %v2051_v20 = vmax.f32 %v2938_v14, 0.0 }
 0x1c0   :  { %v2050_v15 = vmax.f32 %v2907_v9, 0.0  ;;  %v2052_v16 = vmax.f32 %v2939_v10, 0.0  ;;  %2239 = vmatprep.mubr.f32.mxu0 %v2046_v7  ;;  %2384 = vmatprep.mubr.f32.mxu1 %v2048_v8 }
 0x1c1   :  { %2240 = vmatmul.mubr.f32.vlgmr.msra.gmra.mrb[32].mxu0 %v2045_v11  ;;  %2385 = vmatmul.mubr.f32.vlgmr.msra.gmra.mrb[32].mxu1 %v2047_v12 }
 0x1c2   :  { %v1637_v17 = vpop.f32.mrb[4].mxu0  ;;  %v1976_v18 = vpop.f32.mrb[4].mxu1  ;;  %2244 = vmatprep.mubr.f32.mxu0 %v2050_v15  ;;  %2389 = vmatprep.mubr.f32.mxu1 %v2052_v16 }
 0x1c3   :  { %v2908_v21 = vadd.f32 %v1637_v17, %v3693_v55  ;;  %v2940_v22 = vadd.f32 %v1976_v18, %v3695_v56  ;;  %v1639_v23 = vpop.f32.mrb[5].mxu0  ;;  %v1978_v24 = vpop.f32.mrb[5].mxu1 }
 0x1c4   :  { %v2909_v25 = vadd.f32 %v1639_v23, %v3697_v57  ;;  %v2941_v26 = vadd.f32 %v1978_v24, %v3699_v58  ;;  %v1641_v27 = vpop.f32.mrb[6].mxu0  ;;  %v1980_v28 = vpop.f32.mrb[6].mxu1 }
 0x1c5   :  { %v1643_v29 = vpop.f32.mrb[7].mxu0  ;;  %v1982_v30 = vpop.f32.mrb[7].mxu1  ;;  %2245 = vmatmul.mubr.f32.gmra.mrb[34].mxu0 %v2049_v19  ;;  %2390 = vmatmul.mubr.f32.gmra.mrb[34].mxu1 %v2051_v20  ;;  %v2053_v35 = vmax.f32 %v2908_v21, 0.0  ;;  %v2055_v36 = vmax.f32 %v2940_v22, 0.0  ;;  %v2910_v37 = vadd.f32 %v1641_v27, %v3693_v55  ;;  %v2942_v38 = vadd.f32 %v1980_v28, %v3695_v56 }
 0x1c6   :  { %v2054_v31 = vmax.f32 %v2909_v25, 0.0  ;;  %v2056_v32 = vmax.f32 %v2941_v26, 0.0  ;;  %v2911_v33 = vadd.f32 %v1643_v29, %v3697_v57  ;;  %v2943_v34 = vadd.f32 %v1982_v30, %v3699_v58 }
 0x1c7   :  { %v2057_v43 = vmax.f32 %v2910_v37, 0.0  ;;  %v2059_v44 = vmax.f32 %v2942_v38, 0.0 }
 0x1c8   :  { %v2058_v39 = vmax.f32 %v2911_v33, 0.0  ;;  %v2060_v40 = vmax.f32 %v2943_v34, 0.0  ;;  %2249 = vmatprep.mubr.f32.mxu0 %v2054_v31  ;;  %2394 = vmatprep.mubr.f32.mxu1 %v2056_v32 }
 0x1c9   :  { %2250 = vmatmul.mubr.f32.gmra.mrb[36].mxu0 %v2053_v35  ;;  %2395 = vmatmul.mubr.f32.gmra.mrb[36].mxu1 %v2055_v36 }
 0x1ca   :  { %v1647_v41 = vpop.f32.mrb[8].mxu0  ;;  %v1986_v42 = vpop.f32.mrb[8].mxu1  ;;  %2254 = vmatprep.mubr.f32.mxu0 %v2058_v39  ;;  %2399 = vmatprep.mubr.f32.mxu1 %v2060_v40 }
 0x1cb   :  { %v2912_v45 = vadd.f32 %v1647_v41, %v3693_v55  ;;  %v2944_v46 = vadd.f32 %v1986_v42, %v3695_v56  ;;  %v1649_v47 = vpop.f32.mrb[9].mxu0  ;;  %v1988_v48 = vpop.f32.mrb[9].mxu1 }
 0x1cc   :  { %v2913_v49 = vadd.f32 %v1649_v47, %v3697_v57  ;;  %v2945_v50 = vadd.f32 %v1988_v48, %v3699_v58  ;;  %v1651_v51 = vpop.f32.mrb[10].mxu0  ;;  %v1990_v52 = vpop.f32.mrb[10].mxu1 }
 0x1cd   :  { %v1653_v53 = vpop.f32.mrb[11].mxu0  ;;  %v1992_v54 = vpop.f32.mrb[11].mxu1  ;;  %2255 = vmatmul.mubr.f32.gmra.mrb[38].mxu0 %v2057_v43  ;;  %2400 = vmatmul.mubr.f32.gmra.mrb[38].mxu1 %v2059_v44  ;;  %v2061_v63 = vmax.f32 %v2912_v45, 0.0  ;;  %v2063_v0 = vmax.f32 %v2944_v46, 0.0  ;;  %v2914_v1 = vadd.f32 %v1651_v51, %v3693_v55  ;;  %v2946_v2 = vadd.f32 %v1990_v52, %v3695_v56 }
 0x1ce   :  { %v2062_v59 = vmax.f32 %v2913_v49, 0.0  ;;  %v2064_v60 = vmax.f32 %v2945_v50, 0.0  ;;  %v2915_v61 = vadd.f32 %v1653_v53, %v3697_v57  ;;  %v2947_v62 = vadd.f32 %v1992_v54, %v3699_v58 }
 0x1cf   :  { %v2065_v7 = vmax.f32 %v2914_v1, 0.0  ;;  %v2067_v8 = vmax.f32 %v2946_v2, 0.0 }
 0x1d0   :  { %v2066_v3 = vmax.f32 %v2915_v61, 0.0  ;;  %v2068_v4 = vmax.f32 %v2947_v62, 0.0  ;;  %2259 = vmatprep.mubr.f32.mxu0 %v2062_v59  ;;  %2404 = vmatprep.mubr.f32.mxu1 %v2064_v60 }
 0x1d1   :  { %2260 = vmatmul.mubr.f32.gmra.mrb[40].mxu0 %v2061_v63  ;;  %2405 = vmatmul.mubr.f32.gmra.mrb[40].mxu1 %v2063_v0 }
 0x1d2   :  { %v1657_v5 = vpop.f32.mrb[12].mxu0  ;;  %v1996_v6 = vpop.f32.mrb[12].mxu1  ;;  %2264 = vmatprep.mubr.f32.mxu0 %v2066_v3  ;;  %2409 = vmatprep.mubr.f32.mxu1 %v2068_v4 }
 0x1d3   :  { %v2916_v9 = vadd.f32 %v1657_v5, %v3693_v55  ;;  %v2948_v10 = vadd.f32 %v1996_v6, %v3695_v56  ;;  %v1659_v11 = vpop.f32.mrb[13].mxu0  ;;  %v1998_v12 = vpop.f32.mrb[13].mxu1 }
 0x1d4   :  { %v2917_v13 = vadd.f32 %v1659_v11, %v3697_v57  ;;  %v2949_v14 = vadd.f32 %v1998_v12, %v3699_v58  ;;  %v1661_v15 = vpop.f32.mrb[14].mxu0  ;;  %v2000_v16 = vpop.f32.mrb[14].mxu1 }
 0x1d5   :  { %v1663_v17 = vpop.f32.mrb[15].mxu0  ;;  %v2002_v18 = vpop.f32.mrb[15].mxu1  ;;  %2265 = vmatmul.mubr.f32.gmra.mrb[42].mxu0 %v2065_v7  ;;  %2410 = vmatmul.mubr.f32.gmra.mrb[42].mxu1 %v2067_v8  ;;  %v2069_v23 = vmax.f32 %v2916_v9, 0.0  ;;  %v2071_v24 = vmax.f32 %v2948_v10, 0.0  ;;  %v2918_v25 = vadd.f32 %v1661_v15, %v3693_v55  ;;  %v2950_v26 = vadd.f32 %v2000_v16, %v3695_v56 }
 0x1d6   :  { %v2070_v19 = vmax.f32 %v2917_v13, 0.0  ;;  %v2072_v20 = vmax.f32 %v2949_v14, 0.0  ;;  %v2919_v21 = vadd.f32 %v1663_v17, %v3697_v57  ;;  %v2951_v22 = vadd.f32 %v2002_v18, %v3699_v58 }
 0x1d7   :  { %v2073_v31 = vmax.f32 %v2918_v25, 0.0  ;;  %v2075_v32 = vmax.f32 %v2950_v26, 0.0 }
 0x1d8   :  { %v2074_v27 = vmax.f32 %v2919_v21, 0.0  ;;  %v2076_v28 = vmax.f32 %v2951_v22, 0.0  ;;  %2269 = vmatprep.mubr.f32.mxu0 %v2070_v19  ;;  %2414 = vmatprep.mubr.f32.mxu1 %v2072_v20 }
 0x1d9   :  { %2270 = vmatmul.mubr.f32.gmra.mrb[44].mxu0 %v2069_v23  ;;  %2415 = vmatmul.mubr.f32.gmra.mrb[44].mxu1 %v2071_v24 }
 0x1da   :  { %v1667_v29 = vpop.f32.mrb[16].mxu0  ;;  %v2006_v30 = vpop.f32.mrb[16].mxu1  ;;  %2274 = vmatprep.mubr.f32.mxu0 %v2074_v27  ;;  %2419 = vmatprep.mubr.f32.mxu1 %v2076_v28 }
 0x1db   :  { %v2920_v33 = vadd.f32 %v1667_v29, %v3693_v55  ;;  %v2952_v34 = vadd.f32 %v2006_v30, %v3695_v56  ;;  %v1669_v35 = vpop.f32.mrb[17].mxu0  ;;  %v2008_v36 = vpop.f32.mrb[17].mxu1 }
 0x1dc   :  { %v2921_v37 = vadd.f32 %v1669_v35, %v3697_v57  ;;  %v2953_v38 = vadd.f32 %v2008_v36, %v3699_v58  ;;  %v1671_v39 = vpop.f32.mrb[18].mxu0  ;;  %v2010_v40 = vpop.f32.mrb[18].mxu1 }
 0x1dd   :  { %v1673_v41 = vpop.f32.mrb[19].mxu0  ;;  %v2012_v42 = vpop.f32.mrb[19].mxu1  ;;  %2275 = vmatmul.mubr.f32.gmra.mrb[46].mxu0 %v2073_v31  ;;  %2420 = vmatmul.mubr.f32.gmra.mrb[46].mxu1 %v2075_v32  ;;  %v2077_v47 = vmax.f32 %v2920_v33, 0.0  ;;  %v2079_v48 = vmax.f32 %v2952_v34, 0.0  ;;  %v2922_v49 = vadd.f32 %v1671_v39, %v3693_v55  ;;  %v2954_v50 = vadd.f32 %v2010_v40, %v3695_v56 }
 0x1de   :  { %v2078_v43 = vmax.f32 %v2921_v37, 0.0  ;;  %v2080_v44 = vmax.f32 %v2953_v38, 0.0  ;;  %v2923_v45 = vadd.f32 %v1673_v41, %v3697_v57  ;;  %v2955_v46 = vadd.f32 %v2012_v42, %v3699_v58 }
 0x1df   :  { %v2081_v59 = vmax.f32 %v2922_v49, 0.0  ;;  %v2083_v60 = vmax.f32 %v2954_v50, 0.0 }
 0x1e0   :  { %v2082_v51 = vmax.f32 %v2923_v45, 0.0  ;;  %v2084_v52 = vmax.f32 %v2955_v46, 0.0  ;;  %2279 = vmatprep.mubr.f32.mxu0 %v2078_v43  ;;  %2424 = vmatprep.mubr.f32.mxu1 %v2080_v44 }
 0x1e1   :  { %2280 = vmatmul.mubr.f32.gmra.mrb[48].mxu0 %v2077_v47  ;;  %2425 = vmatmul.mubr.f32.gmra.mrb[48].mxu1 %v2079_v48 }
 0x1e2   :  { %v1677_v53 = vpop.f32.mrb[20].mxu0  ;;  %v2016_v54 = vpop.f32.mrb[20].mxu1  ;;  %2284 = vmatprep.mubr.f32.mxu0 %v2082_v51  ;;  %2429 = vmatprep.mubr.f32.mxu1 %v2084_v52 }
 0x1e3   :  { %v2924_v61 = vadd.f32 %v1677_v53, %v3693_v55  ;;  %v2956_v62 = vadd.f32 %v2016_v54, %v3695_v56  ;;  %v1679_v63 = vpop.f32.mrb[21].mxu0  ;;  %v2018_v0 = vpop.f32.mrb[21].mxu1 }
 0x1e4   :  { %v2925_v1 = vadd.f32 %v1679_v63, %v3697_v57  ;;  %v2957_v2 = vadd.f32 %v2018_v0, %v3699_v58  ;;  %v1681_v3 = vpop.f32.mrb[22].mxu0  ;;  %v2020_v4 = vpop.f32.mrb[22].mxu1 }
 0x1e5   :  { %v1683_v5 = vpop.f32.mrb[23].mxu0  ;;  %v2022_v6 = vpop.f32.mrb[23].mxu1  ;;  %2285 = vmatmul.mubr.f32.gmra.mrb[50].mxu0 %v2081_v59  ;;  %2430 = vmatmul.mubr.f32.gmra.mrb[50].mxu1 %v2083_v60  ;;  %v2085_v11 = vmax.f32 %v2924_v61, 0.0  ;;  %v2087_v12 = vmax.f32 %v2956_v62, 0.0  ;;  %v2926_v13 = vadd.f32 %v1681_v3, %v3693_v55  ;;  %v2958_v14 = vadd.f32 %v2020_v4, %v3695_v56 }
 0x1e6   :  { %v2086_v7 = vmax.f32 %v2925_v1, 0.0  ;;  %v2088_v8 = vmax.f32 %v2957_v2, 0.0  ;;  %v2927_v9 = vadd.f32 %v1683_v5, %v3697_v57  ;;  %v2959_v10 = vadd.f32 %v2022_v6, %v3699_v58 }
 0x1e7   :  { %v2089_v19 = vmax.f32 %v2926_v13, 0.0  ;;  %v2091_v20 = vmax.f32 %v2958_v14, 0.0 }
 0x1e8   :  { %v2090_v15 = vmax.f32 %v2927_v9, 0.0  ;;  %v2092_v16 = vmax.f32 %v2959_v10, 0.0  ;;  %2289 = vmatprep.mubr.f32.mxu0 %v2086_v7  ;;  %2434 = vmatprep.mubr.f32.mxu1 %v2088_v8 }
 0x1e9   :  { %2290 = vmatmul.mubr.f32.gmra.mrb[52].mxu0 %v2085_v11  ;;  %2435 = vmatmul.mubr.f32.gmra.mrb[52].mxu1 %v2087_v12 }
 0x1ea   :  { %v1687_v17 = vpop.f32.mrb[24].mxu0  ;;  %v2026_v18 = vpop.f32.mrb[24].mxu1  ;;  %2294 = vmatprep.mubr.f32.mxu0 %v2090_v15  ;;  %2439 = vmatprep.mubr.f32.mxu1 %v2092_v16 }
 0x1eb   :  { %v2928_v21 = vadd.f32 %v1687_v17, %v3693_v55  ;;  %v2960_v22 = vadd.f32 %v2026_v18, %v3695_v56  ;;  %v1689_v23 = vpop.f32.mrb[25].mxu0  ;;  %v2028_v24 = vpop.f32.mrb[25].mxu1 }
 0x1ec   :  { %v2929_v25 = vadd.f32 %v1689_v23, %v3697_v57  ;;  %v2961_v26 = vadd.f32 %v2028_v24, %v3699_v58  ;;  %v1691_v27 = vpop.f32.mrb[26].mxu0  ;;  %v2030_v28 = vpop.f32.mrb[26].mxu1 }
 0x1ed   :  { %v1693_v29 = vpop.f32.mrb[27].mxu0  ;;  %v2032_v30 = vpop.f32.mrb[27].mxu1  ;;  %2295 = vmatmul.mubr.f32.gmra.mrb[54].mxu0 %v2089_v19  ;;  %2440 = vmatmul.mubr.f32.gmra.mrb[54].mxu1 %v2091_v20  ;;  %v2093_v35 = vmax.f32 %v2928_v21, 0.0  ;;  %v2095_v36 = vmax.f32 %v2960_v22, 0.0  ;;  %v2930_v37 = vadd.f32 %v1691_v27, %v3693_v55  ;;  %v2962_v38 = vadd.f32 %v2030_v28, %v3695_v56 }
 0x1ee   :  { %v2094_v31 = vmax.f32 %v2929_v25, 0.0  ;;  %v2096_v32 = vmax.f32 %v2961_v26, 0.0  ;;  %v2931_v33 = vadd.f32 %v1693_v29, %v3697_v57  ;;  %v2963_v34 = vadd.f32 %v2032_v30, %v3699_v58 }
 0x1ef   :  { %v2097_v43 = vmax.f32 %v2930_v37, 0.0  ;;  %v2099_v44 = vmax.f32 %v2962_v38, 0.0 }
 0x1f0   :  { %v2098_v39 = vmax.f32 %v2931_v33, 0.0  ;;  %v2100_v40 = vmax.f32 %v2963_v34, 0.0  ;;  %2299 = vmatprep.mubr.f32.mxu0 %v2094_v31  ;;  %2444 = vmatprep.mubr.f32.mxu1 %v2096_v32 }
 0x1f1   :  { %2300 = vmatmul.mubr.f32.gmra.mrb[56].mxu0 %v2093_v35  ;;  %2445 = vmatmul.mubr.f32.gmra.mrb[56].mxu1 %v2095_v36 }
 0x1f2   :  { %v1697_v41 = vpop.f32.mrb[28].mxu0  ;;  %v2036_v42 = vpop.f32.mrb[28].mxu1  ;;  %2304 = vmatprep.mubr.f32.mxu0 %v2098_v39  ;;  %2449 = vmatprep.mubr.f32.mxu1 %v2100_v40 }
 0x1f3   :  { %v2932_v45 = vadd.f32 %v1697_v41, %v3693_v55  ;;  %v2964_v46 = vadd.f32 %v2036_v42, %v3695_v56  ;;  %v1699_v47 = vpop.f32.mrb[29].mxu0  ;;  %v2038_v48 = vpop.f32.mrb[29].mxu1 }
 0x1f4   :  { %v2933_v49 = vadd.f32 %v1699_v47, %v3697_v57  ;;  %v2965_v50 = vadd.f32 %v2038_v48, %v3699_v58  ;;  %v1701_v51 = vpop.f32.mrb[30].mxu0  ;;  %v2040_v52 = vpop.f32.mrb[30].mxu1 }
 0x1f5   :  { %v1703_v53 = vpop.f32.mrb[31].mxu0  ;;  %v2042_v54 = vpop.f32.mrb[31].mxu1  ;;  %2305 = vmatmul.mubr.f32.gmra.mrb[58].mxu0 %v2097_v43  ;;  %2450 = vmatmul.mubr.f32.gmra.mrb[58].mxu1 %v2099_v44  ;;  %v2101_v63 = vmax.f32 %v2932_v45, 0.0  ;;  %v2103_v0 = vmax.f32 %v2964_v46, 0.0  ;;  %v2934_v1 = vadd.f32 %v1701_v51, %v3693_v55  ;;  %v2966_v2 = vadd.f32 %v2040_v52, %v3695_v56 }
 0x1f6   :  { %v2102_v59 = vmax.f32 %v2933_v49, 0.0  ;;  %v2104_v60 = vmax.f32 %v2965_v50, 0.0  ;;  %v2935_v61 = vadd.f32 %v1703_v53, %v3697_v57  ;;  %v2967_v62 = vadd.f32 %v2042_v54, %v3699_v58 }
 0x1f7   :  { %v2105_v5 = vmax.f32 %v2934_v1, 0.0  ;;  %v2107_v6 = vmax.f32 %v2966_v2, 0.0  ;;  %v3768_v55 = vstv %s3854_s4 }
 0x1f8   :  { %v2106_v3 = vmax.f32 %v2935_v61, 0.0  ;;  %v2108_v4 = vmax.f32 %v2967_v62, 0.0  ;;  %2309 = vmatprep.mubr.f32.mxu0 %v2102_v59  ;;  %2454 = vmatprep.mubr.f32.mxu1 %v2104_v60 }
 0x1f9   :  { %2310 = vmatmul.mubr.f32.gmra.mrb[60].mxu0 %v2101_v63  ;;  %2455 = vmatmul.mubr.f32.gmra.mrb[60].mxu1 %v2103_v0 }
 0x1fa   :  { %2314 = vmatprep.mubr.f32.mxu0 %v2106_v3  ;;  %2459 = vmatprep.mubr.f32.mxu1 %v2108_v4 }
 0x1fd   :  { %2315 = vmatmul.mubr.f32.gmra.mrb[62].mxu0 %v2105_v5  ;;  %2460 = vmatmul.mubr.f32.gmra.mrb[62].mxu1 %v2107_v6 }
 0x294   :  { %v2712_v57 = vpop.f32.mrb[32].mxu0  ;;  %v2792_v58 = vpop.f32.mrb[32].mxu1 }
 0x295   :  { %v2713_v56 = vpop.f32.mrb[33].mxu0  ;;  %v2793_v7 = vpop.f32.mrb[33].mxu1 }
 0x296   :  { %v2714_v8 = vadd.f32 %v2713_v56, %v2712_v57  ;;  %v2794_v9 = vadd.f32 %v2793_v7, %v2792_v58 }
 0x298   :  { %v2242_v10 = vadd.f32 %v2714_v8, %v3768_v55  ;;  %v2715_v11 = vpop.f32.mrb[34].mxu0  ;;  %v2795_v12 = vpop.f32.mrb[34].mxu1 }
 0x299   :  { %v2716_v13 = vpop.f32.mrb[35].mxu0  ;;  %v2796_v14 = vpop.f32.mrb[35].mxu1 }
 0x29a   :  { %v2387_v15 = vadd.f32 %v2794_v9, %v2242_v10  ;;  %v2717_v16 = vadd.f32 %v2716_v13, %v2715_v11  ;;  %v2797_v17 = vadd.f32 %v2796_v14, %v2795_v12 }
 0x29c   :  { %2466 = vst.msk [vmem:[%s3855_s5] sm:$0xff] %vm2465_vm0, %v2387_v15  ;;  %v2247_v18 = vadd.f32 %v2717_v16, %v3768_v55  ;;  %v2718_v19 = vpop.f32.mrb[36].mxu0  ;;  %v2798_v20 = vpop.f32.mrb[36].mxu1 }
 0x29d   :  { %v2719_v21 = vpop.f32.mrb[37].mxu0  ;;  %v2799_v22 = vpop.f32.mrb[37].mxu1 }
 0x29e   :  { %v2392_v23 = vadd.f32 %v2797_v17, %v2247_v18  ;;  %v2720_v24 = vadd.f32 %v2719_v21, %v2718_v19  ;;  %v2800_v25 = vadd.f32 %v2799_v22, %v2798_v20 }
 0x2a0   :  { %2467 = vst.msk [vmem:[%s3855_s5 + $0x8] sm:$0xff] %vm2465_vm0, %v2392_v23  ;;  %v2252_v26 = vadd.f32 %v2720_v24, %v3768_v55  ;;  %v2721_v27 = vpop.f32.mrb[38].mxu0  ;;  %v2801_v28 = vpop.f32.mrb[38].mxu1 }
 0x2a1   :  { %v2722_v29 = vpop.f32.mrb[39].mxu0  ;;  %v2802_v30 = vpop.f32.mrb[39].mxu1 }
 0x2a2   :  { %v2397_v31 = vadd.f32 %v2800_v25, %v2252_v26  ;;  %v2723_v32 = vadd.f32 %v2722_v29, %v2721_v27  ;;  %v2803_v33 = vadd.f32 %v2802_v30, %v2801_v28 }
 0x2a4   :  { %2468 = vst.msk [vmem:[%s3855_s5 + $0x10] sm:$0xff] %vm2465_vm0, %v2397_v31  ;;  %v2257_v34 = vadd.f32 %v2723_v32, %v3768_v55  ;;  %v2724_v35 = vpop.f32.mrb[40].mxu0  ;;  %v2804_v36 = vpop.f32.mrb[40].mxu1 }
 0x2a5   :  { %v2725_v37 = vpop.f32.mrb[41].mxu0  ;;  %v2805_v38 = vpop.f32.mrb[41].mxu1 }
 0x2a6   :  { %v2402_v39 = vadd.f32 %v2803_v33, %v2257_v34  ;;  %v2726_v40 = vadd.f32 %v2725_v37, %v2724_v35  ;;  %v2806_v41 = vadd.f32 %v2805_v38, %v2804_v36 }
 0x2a8   :  { %2469 = vst.msk [vmem:[%s3855_s5 + $0x18] sm:$0xff] %vm2465_vm0, %v2402_v39  ;;  %v2262_v42 = vadd.f32 %v2726_v40, %v3768_v55  ;;  %v2727_v43 = vpop.f32.mrb[42].mxu0  ;;  %v2807_v44 = vpop.f32.mrb[42].mxu1 }
 0x2a9   :  { %v2728_v45 = vpop.f32.mrb[43].mxu0  ;;  %v2808_v46 = vpop.f32.mrb[43].mxu1 }
 0x2aa   :  { %v2407_v47 = vadd.f32 %v2806_v41, %v2262_v42  ;;  %v2729_v48 = vadd.f32 %v2728_v45, %v2727_v43  ;;  %v2809_v49 = vadd.f32 %v2808_v46, %v2807_v44 }
 0x2ac   :  { %2470 = vst.msk [vmem:[%s3855_s5 + $0x20] sm:$0xff] %vm2465_vm0, %v2407_v47  ;;  %v2267_v50 = vadd.f32 %v2729_v48, %v3768_v55  ;;  %v2730_v51 = vpop.f32.mrb[44].mxu0  ;;  %v2810_v52 = vpop.f32.mrb[44].mxu1 }
 0x2ad   :  { %v2731_v53 = vpop.f32.mrb[45].mxu0  ;;  %v2811_v54 = vpop.f32.mrb[45].mxu1 }
 0x2ae   :  { %v2412_v59 = vadd.f32 %v2809_v49, %v2267_v50  ;;  %v2732_v60 = vadd.f32 %v2731_v53, %v2730_v51  ;;  %v2812_v61 = vadd.f32 %v2811_v54, %v2810_v52 }
 0x2b0   :  { %2471 = vst.msk [vmem:[%s3855_s5 + $0x28] sm:$0xff] %vm2465_vm0, %v2412_v59  ;;  %v2272_v62 = vadd.f32 %v2732_v60, %v3768_v55  ;;  %v2733_v63 = vpop.f32.mrb[46].mxu0  ;;  %v2813_v0 = vpop.f32.mrb[46].mxu1 }
 0x2b1   :  { %v2734_v1 = vpop.f32.mrb[47].mxu0  ;;  %v2814_v2 = vpop.f32.mrb[47].mxu1 }
 0x2b2   :  { %v2417_v3 = vadd.f32 %v2812_v61, %v2272_v62  ;;  %v2735_v4 = vadd.f32 %v2734_v1, %v2733_v63  ;;  %v2815_v5 = vadd.f32 %v2814_v2, %v2813_v0 }
 0x2b4   :  { %2472 = vst.msk [vmem:[%s3855_s5 + $0x30] sm:$0xff] %vm2465_vm0, %v2417_v3  ;;  %v2277_v6 = vadd.f32 %v2735_v4, %v3768_v55  ;;  %v2736_v57 = vpop.f32.mrb[48].mxu0  ;;  %v2816_v58 = vpop.f32.mrb[48].mxu1 }
 0x2b5   :  { %v2737_v56 = vpop.f32.mrb[49].mxu0  ;;  %v2817_v7 = vpop.f32.mrb[49].mxu1 }
 0x2b6   :  { %v2422_v8 = vadd.f32 %v2815_v5, %v2277_v6  ;;  %v2738_v9 = vadd.f32 %v2737_v56, %v2736_v57  ;;  %v2818_v10 = vadd.f32 %v2817_v7, %v2816_v58 }
 0x2b8   :  { %2473 = vst.msk [vmem:[%s3855_s5 + $0x38] sm:$0xff] %vm2465_vm0, %v2422_v8  ;;  %v2282_v11 = vadd.f32 %v2738_v9, %v3768_v55  ;;  %v2739_v12 = vpop.f32.mrb[50].mxu0  ;;  %v2819_v13 = vpop.f32.mrb[50].mxu1 }
 0x2b9   :  { %v2740_v14 = vpop.f32.mrb[51].mxu0  ;;  %v2820_v15 = vpop.f32.mrb[51].mxu1 }
 0x2ba   :  { %v2427_v16 = vadd.f32 %v2818_v10, %v2282_v11  ;;  %v2741_v17 = vadd.f32 %v2740_v14, %v2739_v12  ;;  %v2821_v18 = vadd.f32 %v2820_v15, %v2819_v13 }
 0x2bc   :  { %2474 = vst.msk [vmem:[%s3855_s5 + $0x40] sm:$0xff] %vm2465_vm0, %v2427_v16  ;;  %v2287_v19 = vadd.f32 %v2741_v17, %v3768_v55  ;;  %v2742_v20 = vpop.f32.mrb[52].mxu0  ;;  %v2822_v21 = vpop.f32.mrb[52].mxu1 }
 0x2bd   :  { %v2743_v22 = vpop.f32.mrb[53].mxu0  ;;  %v2823_v23 = vpop.f32.mrb[53].mxu1 }
 0x2be   :  { %v2432_v24 = vadd.f32 %v2821_v18, %v2287_v19  ;;  %v2744_v25 = vadd.f32 %v2743_v22, %v2742_v20  ;;  %v2824_v26 = vadd.f32 %v2823_v23, %v2822_v21 }
 0x2c0   :  { %2475 = vst.msk [vmem:[%s3855_s5 + $0x48] sm:$0xff] %vm2465_vm0, %v2432_v24  ;;  %v2292_v27 = vadd.f32 %v2744_v25, %v3768_v55  ;;  %v2745_v28 = vpop.f32.mrb[54].mxu0  ;;  %v2825_v29 = vpop.f32.mrb[54].mxu1 }
 0x2c1   :  { %v2746_v30 = vpop.f32.mrb[55].mxu0  ;;  %v2826_v31 = vpop.f32.mrb[55].mxu1 }
 0x2c2   :  { %v2437_v32 = vadd.f32 %v2824_v26, %v2292_v27  ;;  %v2747_v33 = vadd.f32 %v2746_v30, %v2745_v28  ;;  %v2827_v34 = vadd.f32 %v2826_v31, %v2825_v29 }
 0x2c4   :  { %2476 = vst.msk [vmem:[%s3855_s5 + $0x50] sm:$0xff] %vm2465_vm0, %v2437_v32  ;;  %v2297_v35 = vadd.f32 %v2747_v33, %v3768_v55  ;;  %v2748_v36 = vpop.f32.mrb[56].mxu0  ;;  %v2828_v37 = vpop.f32.mrb[56].mxu1 }
 0x2c5   :  { %v2749_v38 = vpop.f32.mrb[57].mxu0  ;;  %v2829_v39 = vpop.f32.mrb[57].mxu1 }
 0x2c6   :  { %v2442_v40 = vadd.f32 %v2827_v34, %v2297_v35  ;;  %v2750_v41 = vadd.f32 %v2749_v38, %v2748_v36  ;;  %v2830_v42 = vadd.f32 %v2829_v39, %v2828_v37 }
 0x2c8   :  { %2477 = vst.msk [vmem:[%s3855_s5 + $0x58] sm:$0xff] %vm2465_vm0, %v2442_v40  ;;  %v2302_v43 = vadd.f32 %v2750_v41, %v3768_v55  ;;  %v2751_v44 = vpop.f32.mrb[58].mxu0  ;;  %v2831_v45 = vpop.f32.mrb[58].mxu1 }
 0x2c9   :  { %v2752_v46 = vpop.f32.mrb[59].mxu0  ;;  %v2832_v47 = vpop.f32.mrb[59].mxu1 }
 0x2ca   :  { %v2447_v48 = vadd.f32 %v2830_v42, %v2302_v43  ;;  %v2753_v49 = vadd.f32 %v2752_v46, %v2751_v44  ;;  %v2833_v50 = vadd.f32 %v2832_v47, %v2831_v45 }
 0x2cc   :  { %2478 = vst.msk [vmem:[%s3855_s5 + $0x60] sm:$0xff] %vm2465_vm0, %v2447_v48  ;;  %v2307_v51 = vadd.f32 %v2753_v49, %v3768_v55  ;;  %v2754_v52 = vpop.f32.mrb[60].mxu0  ;;  %v2834_v53 = vpop.f32.mrb[60].mxu1 }
 0x2cd   :  { %v2755_v54 = vpop.f32.mrb[61].mxu0  ;;  %v2835_v59 = vpop.f32.mrb[61].mxu1 }
 0x2ce   :  { %v2452_v60 = vadd.f32 %v2833_v50, %v2307_v51  ;;  %v2756_v61 = vadd.f32 %v2755_v54, %v2754_v52  ;;  %v2836_v62 = vadd.f32 %v2835_v59, %v2834_v53 }
 0x2d0   :  { %2479 = vst.msk [vmem:[%s3855_s5 + $0x68] sm:$0xff] %vm2465_vm0, %v2452_v60  ;;  %v2312_v63 = vadd.f32 %v2756_v61, %v3768_v55  ;;  %v2757_v0 = vpop.f32.mrb[62].mxu0  ;;  %v2837_v1 = vpop.f32.mrb[62].mxu1 }
 0x2d1   :  { %v2758_v2 = vpop.f32.mrb[63].mxu0  ;;  %v2838_v3 = vpop.f32.mrb[63].mxu1 }
 0x2d2   :  { %v2457_v4 = vadd.f32 %v2836_v62, %v2312_v63  ;;  %v2759_v5 = vadd.f32 %v2758_v2, %v2757_v0  ;;  %v2839_v6 = vadd.f32 %v2838_v3, %v2837_v1 }
 0x2d4   :  { %2480 = vst.msk [vmem:[%s3855_s5 + $0x70] sm:$0xff] %vm2465_vm0, %v2457_v4  ;;  %v2317_v57 = vadd.f32 %v2759_v5, %v3768_v55 }
 0x2d6   :  { %v2462_v58 = vadd.f32 %v2839_v6, %v2317_v57 }
 0x2d8   :  { %2481 = vst.msk [vmem:[%s3855_s5 + $0x78] sm:$0xff] %vm2465_vm0, %v2462_v58 }
 0x2d9   :  { %2486 = vsyncpa [#allocation4], 1 }
 0x2da   :  { %2487 = vsyncpa [#allocation6], 1 }

</bundles_post_ra>
